<compile_context>
chip_gen: v7x
topology: tpu7x:2x2x1
jax: 0.10.0
libtpu: 0.0.40
codegen_flags: <defaults>
</compile_context>

<pallas_src>
from functools import partial
from typing import NamedTuple

import jax
import jax.numpy as jnp
from jax.experimental import pallas as pl
from jax.experimental.pallas import tpu as pltpu


def _round_up(x, m):
    return (x + m - 1) // m * m


# ----------------------------------------------------------------------------
# Tiling plan (static, computed once per layer at prepare time)
# ----------------------------------------------------------------------------
class LinearPlan(NamedTuple):
    K: int
    N: int
    Kp: int
    Np: int
    tk: int
    tn: int
    nk: int
    nj: int
    relu: bool


def _pick_tile(dim128, t_max):
    """Largest multiple-of-128 tile near t_max that divides dim128 exactly.

    Searching [t_max/2, ~1.125*t_max] keeps tiles big (long contiguous DMA rows)
    while avoiding padding waste on dims like 10880 = 128*85 (-> 2176) or
    21632 = 128*169 (-> 1664).  Falls back to t_max (plain round-up padding).
    """
    hi = max(t_max, (t_max + t_max // 8) // 128 * 128)
    lo = max(128, t_max // 2)
    for cand in range(hi, lo - 1, -128):
        if dim128 % cand == 0:
            return cand
    return t_max


def _plan_linear(K, N, relu, tk_max, tn_max):
    assert tk_max % 128 == 0 and tn_max % 128 == 0
    # K (reduction) axis.
    K8 = _round_up(K, 8)
    if K8 <= tk_max:
        tk, Kp = K8, K8                      # single chunk, x sliced as full block
    else:
        tk = _pick_tile(_round_up(K, 128), tk_max)   # 128-multiple -> aligned lane slice
        Kp = _round_up(K, tk)
    nk = Kp // tk
    # N (output) axis.
    N128 = _round_up(N, 128)
    if N128 <= tn_max:
        tn, Np = N128, N128
    else:
        tn = _pick_tile(N128, tn_max)
        Np = _round_up(N, tn)
    nj = Np // tn
    return LinearPlan(K=K, N=N, Kp=Kp, Np=Np, tk=tk, tn=tn, nk=nk, nj=nj, relu=relu)


# ----------------------------------------------------------------------------
# Pallas kernels
# ----------------------------------------------------------------------------
def _linear_kernel(x_ref, w_ref, b_ref, o_ref, *, apply_relu, tk, nk):
    """One (M, tn) output tile; K reduction over the innermost grid axis.

    x_ref holds the FULL (M, Kp) f32 activation (VMEM-resident, fetched once per
    layer); w_ref is the streamed (tk, tn) bf16 weight tile.  o_ref (f32) doubles
    as the accumulator: its block index is constant across the k axis, so it
    stays VMEM-resident for the whole reduction.
    """
    bf16 = jnp.bfloat16

    if nk == 1:
        y = jnp.dot(x_ref[...].astype(bf16), w_ref[...],
                    preferred_element_type=jnp.float32)
        y = y + b_ref[...]
        if apply_relu:
            y = jnp.maximum(y, 0.0)
        o_ref[...] = y
    else:
        k = pl.program_id(1)
        # nk > 1 implies tk is a 128-multiple -> lane-aligned dynamic slice.
        x_blk = x_ref[:, pl.ds(pl.multiple_of(k * tk, tk), tk)].astype(bf16)
        part = jnp.dot(x_blk, w_ref[...], preferred_element_type=jnp.float32)

        @pl.when(k == 0)
        def _():
            o_ref[...] = part               # direct assign: no zero-fill pass

        @pl.when(k > 0)
        def _():
            o_ref[...] += part

        @pl.when(k == nk - 1)
        def _():
            y = o_ref[...] + b_ref[...]     # bias broadcast over batch rows
            if apply_relu:
                y = jnp.maximum(y, 0.0)
            o_ref[...] = y


def _tail_kernel(h_ref, we_ref, be_ref, wmu_ref, bmu_ref, wlv_ref, blv_ref,
                 wd_ref, bd_ref, eps_ref, enc_ref, mu_ref, lv_ref, hdec_ref):
    """Fused network tail, all weights fully VMEM-resident:

        encoded = relu(h @ We + be)          (last encoder layer)
        mu      = encoded @ Wmu + bmu
        log_var = encoded @ Wlv + blv
        z       = mu + eps * exp(0.5*log_var)
        h_dec   = relu(z @ Wd + bd)          (first decoder layer)
    """
    bf16, f32 = jnp.bfloat16, jnp.float32

    enc = jnp.dot(h_ref[...].astype(bf16), we_ref[...],
                  preferred_element_type=f32) + be_ref[...]
    enc = jnp.maximum(enc, 0.0)
    enc_ref[...] = enc

    enc_b = enc.astype(bf16)
    mu = jnp.dot(enc_b, wmu_ref[...], preferred_element_type=f32) + bmu_ref[...]
    lv = jnp.dot(enc_b, wlv_ref[...], preferred_element_type=f32) + blv_ref[...]
    mu_ref[...] = mu
    lv_ref[...] = lv

    z = mu + eps_ref[...] * jnp.exp(0.5 * lv)
    hd = jnp.dot(z.astype(bf16), wd_ref[...], preferred_element_type=f32) + bd_ref[...]
    hdec_ref[...] = jnp.maximum(hd, 0.0)


# ----------------------------------------------------------------------------
# Wrappers
# ----------------------------------------------------------------------------
def pallas_linear(x, w, b, plan: LinearPlan, *, weight_buffers=None,
                  vmem_limit_bytes=48 * 1024 * 1024):
    """y = x @ w + b (optionally ReLU) with pre-padded bf16 weights.

    x: (M, K) f32.  w: (Kp, Np) bf16 (padded once at prepare time).
    b: (1, Np) f32.  Only the tiny activation is padded per call.
    """
    M, K = x.shape
    assert K == plan.K and w.shape == (plan.Kp, plan.Np)

    if plan.Kp != K:                          # (8, K) f32 pad — negligible traffic
        x = jnp.pad(x, ((0, 0), (0, plan.Kp - K)))

    w_spec_kwargs = {}
    if weight_buffers is not None:            # optional: pl.Buffered(3) sweep knob
        w_spec_kwargs["pipeline_mode"] = pl.Buffered(weight_buffers)

    kernel = partial(_linear_kernel, apply_relu=plan.relu, tk=plan.tk, nk=plan.nk)

    out = pl.pallas_call(
        kernel,
        out_shape=jax.ShapeDtypeStruct((M, plan.Np), jnp.float32),
        grid_spec=pltpu.PrefetchScalarGridSpec(
            num_scalar_prefetch=0,
            grid=(plan.nj, plan.nk),
            in_specs=[
                # x: fully VMEM-resident — fetched once per layer.
                pl.BlockSpec((M, plan.Kp), lambda j, k: (0, 0)),
                # w: large lane-dense bf16 tiles — the dominant HBM stream.
                pl.BlockSpec((plan.tk, plan.tn), lambda j, k: (k, j), **w_spec_kwargs),
                # bias tile for the current N block.
                pl.BlockSpec((1, plan.tn), lambda j, k: (0, j)),
            ],
            # Constant across k -> VMEM-resident accumulator; written back once per j.
            out_specs=pl.BlockSpec((M, plan.tn), lambda j, k: (0, j)),
        ),
        compiler_params=pltpu.CompilerParams(
            dimension_semantics=("parallel", "arbitrary"),
            vmem_limit_bytes=vmem_limit_bytes,
        ),
        cost_estimate=pl.CostEstimate(
            flops=2 * M * plan.Np * plan.Kp,
            transcendentals=0,
            bytes_accessed=plan.Kp * plan.Np * w.dtype.itemsize
            + (M * plan.Kp + M * plan.Np + plan.Np) * 4,
        ),
    )(x, w, b)

    return out[:, :plan.N] if plan.Np != plan.N else out


def pallas_tail(h, tail, eps, *, vmem_limit_bytes=48 * 1024 * 1024):
    """Fused last-encoder-layer + mu/log_var + reparameterize + first-decoder-layer."""
    M = h.shape[0]
    L = tail["wmu"].shape[1]
    H3 = tail["wd"].shape[1]
    vmem = pl.BlockSpec(memory_space=pltpu.MemorySpace.VMEM)
    f32 = jnp.float32

    enc, mu, log_var, hdec = pl.pallas_call(
        _tail_kernel,
        out_shape=(
            jax.ShapeDtypeStruct((M, L), f32),   # encoded
            jax.ShapeDtypeStruct((M, L), f32),   # mu
            jax.ShapeDtypeStruct((M, L), f32),   # log_var
            jax.ShapeDtypeStruct((M, H3), f32),  # first decoder activation
        ),
        in_specs=[vmem] * 10,
        out_specs=(vmem, vmem, vmem, vmem),
        compiler_params=pltpu.CompilerParams(vmem_limit_bytes=vmem_limit_bytes),
    )(h, tail["we"], tail["be"], tail["wmu"], tail["bmu"],
      tail["wlv"], tail["blv"], tail["wd"], tail["bd"], eps)
    return enc, mu, log_var, hdec


# ----------------------------------------------------------------------------
# Parameter construction / one-time preparation
# ----------------------------------------------------------------------------
def _init_linear(key, fan_in, fan_out, dtype=jnp.float32):
    kw, kb = jax.random.split(key)
    bound = 1.0 / jnp.sqrt(fan_in)
    w = jax.random.uniform(kw, (fan_in, fan_out), dtype, -bound, bound)
    b = jax.random.uniform(kb, (fan_out,), dtype, -bound, bound)
    return w, b


def init_vae_params(key, input_size, hidden_dims, latent_dim):
    """hidden_dims stands in for (21600, 10800, 4096) at small scale."""
    h1, h2, h3 = hidden_dims
    enc_dims = [(input_size, h1), (h1, h2), (h2, h3), (h3, latent_dim)]
    dec_dims = [(latent_dim, h3), (h3, h2), (h2, h1), (h1, input_size)]
    keys = jax.random.split(key, len(enc_dims) + len(dec_dims) + 2)
    return {
        "encoder": [_init_linear(keys[i], *d) for i, d in enumerate(enc_dims)],
        "decoder": [_init_linear(keys[len(enc_dims) + i], *d)
                    for i, d in enumerate(dec_dims)],
        "mu": _init_linear(keys[-2], latent_dim, latent_dim),
        "log_var": _init_linear(keys[-1], latent_dim, latent_dim),
    }


def _prep_linear(w, b, plan: LinearPlan, weight_dtype):
    K, N = w.shape
    wp = jnp.pad(w, ((0, plan.Kp - K), (0, plan.Np - N))).astype(weight_dtype)
    bp = jnp.pad(b, (0, plan.Np - N)).reshape(1, plan.Np).astype(jnp.float32)
    return {"w": wp, "b": bp}


def prepare_vae(raw, *, tk_max=1024, tn_max=2048, weight_dtype=jnp.bfloat16):
    """One-time weight preparation: pad to the tile grid and cast to bf16.

    Returns (plans, params): `plans` is static Python metadata (bind it via
    functools.partial / closure before jit), `params` holds only device arrays.
    Defaults are v7x-safe (<= ~8 MiB double-buffered weight tiles); on v6e/v5e
    (128 MiB VMEM) tk_max/tn_max can be raised (e.g. 2048/4096).
    """
    enc_raw, dec_raw = raw["encoder"], raw["decoder"]

    enc_plans, enc_params = [], []
    for (w, b) in enc_raw[:-1]:                         # all streamed encoder layers
        plan = _plan_linear(w.shape[0], w.shape[1], True, tk_max, tn_max)
        enc_plans.append(plan)
        enc_params.append(_prep_linear(w, b, plan, weight_dtype))

    dec_plans, dec_params = [], []
    n_dec = len(dec_raw)
    for i in range(1, n_dec):                           # streamed decoder layers
        w, b = dec_raw[i]
        plan = _plan_linear(w.shape[0], w.shape[1], i < n_dec - 1, tk_max, tn_max)
        dec_plans.append(plan)
        dec_params.append(_prep_linear(w, b, plan, weight_dtype))

    (we, be) = enc_raw[-1]
    (wd, bd) = dec_raw[0]
    (wmu, bmu) = raw["mu"]
    (wlv, blv) = raw["log_var"]
    tail = {
        "we": we.astype(weight_dtype), "be": be.reshape(1, -1).astype(jnp.float32),
        "wmu": wmu.astype(weight_dtype), "bmu": bmu.reshape(1, -1).astype(jnp.float32),
        "wlv": wlv.astype(weight_dtype), "blv": blv.reshape(1, -1).astype(jnp.float32),
        "wd": wd.astype(weight_dtype), "bd": bd.reshape(1, -1).astype(jnp.float32),
    }

    plans = {"enc": tuple(enc_plans), "dec": tuple(dec_plans)}
    params = {"enc": enc_params, "dec": dec_params, "tail": tail}
    return plans, params


# ----------------------------------------------------------------------------
# VAE forward (matches VAE.forward: encoded, decoded, mu, log_var)
# ----------------------------------------------------------------------------
def vae_forward(plans, params, x, eps):
    h = x
    for plan, layer in zip(plans["enc"], params["enc"]):        # encoder layers 0..2
        h = pallas_linear(h, layer["w"], layer["b"], plan)

    # fused: last encoder layer + mu/log_var heads + reparam + first decoder layer
    encoded, mu, log_var, h = pallas_tail(h, params["tail"], eps)

    for plan, layer in zip(plans["dec"], params["dec"]):        # decoder layers 1..3
        h = pallas_linear(h, layer["w"], layer["b"], plan)
    decoded = h
    return encoded, decoded, mu, log_var


def vae_forward_ref(raw, x, eps, weight_dtype=jnp.bfloat16):
    """Plain-JAX reference mirroring the kernels' bf16-operand / f32-accum math."""
    def lin(h, w, b, relu):
        y = jnp.dot(h.astype(weight_dtype), w.astype(weight_dtype),
                    preferred_element_type=jnp.float32) + b
        return jnp.maximum(y, 0.0) if relu else y

    h = x
    for (w, b) in raw["encoder"]:
        h = lin(h, w, b, True)
    encoded = h
    mu = lin(encoded, *raw["mu"], False)
    log_var = lin(encoded, *raw["log_var"], False)
    z = mu + eps * jnp.exp(0.5 * log_var)
    h = z
    n_dec = len(raw["decoder"])
    for i, (w, b) in enumerate(raw["decoder"]):
        h = lin(h, w, b, i < n_dec - 1)
    return encoded, h, mu, log_var


# ----------------------------------------------------------------------------
# Main
# ----------------------------------------------------------------------------
if __name__ == "__main__":
    # Small shapes standing in for (input_size, 21600, 10800, 4096, latent=256).
    # INPUT_SIZE deliberately not a multiple of 128 to exercise the padding path.
    BATCH = 8
    INPUT_SIZE = 200
    HIDDEN_DIMS = (512, 384, 256)
    LATENT_DIM = 128

    root = jax.random.PRNGKey(0)
    k_params, k_x, k_eps = jax.random.split(root, 3)

    raw_params = init_vae_params(k_params, INPUT_SIZE, HIDDEN_DIMS, LATENT_DIM)
    x = jax.random.normal(k_x, (BATCH, INPUT_SIZE), jnp.float32)
    eps = jax.random.normal(k_eps, (BATCH, LATENT_DIM), jnp.float32)

    ref = vae_forward_ref(raw_params, x, eps)

    # (a) production-style big tiles (single-tile grids at this small scale).
    plans, params = prepare_vae(raw_params)
    fwd = jax.jit(partial(vae_forward, plans))
    out_big = fwd(params, x, eps)
    jax.block_until_ready(out_big)

    # (b) tiny tiles to exercise the multi-tile K-accumulation / padding / divisor path.
    plans_s, params_s = prepare_vae(raw_params, tk_max=128, tn_max=128)
    fwd_s = jax.jit(partial(vae_forward, plans_s))
    out_small = fwd_s(params_s, x, eps)
    jax.block_until_ready(out_small)

    names = ("encoded", "decoded", "mu", "log_var")
    for outs in (out_big, out_small):
        encoded, decoded, mu, log_var = outs
        assert encoded.shape == (BATCH, LATENT_DIM)
        assert decoded.shape == (BATCH, INPUT_SIZE)
        assert mu.shape == (BATCH, LATENT_DIM)
        assert log_var.shape == (BATCH, LATENT_DIM)
        for name, got, want in zip(names, outs, ref):
            assert bool(jnp.all(jnp.isfinite(got))), f"{name}: non-finite values"
            assert bool(jnp.allclose(got, want, rtol=2e-3, atol=2e-3)), \
                f"Pallas output mismatch vs reference: {name}"

    print("KERNEL_OK")
</pallas_src>

<mosaic_0001>
module attributes {stable_mosaic.version = 11 : i64} {
  func.func @_tail_kernel(%arg0: memref<8x256xf32, #tpu.memory_space<vmem>>, %arg1: memref<256x128xbf16, #tpu.memory_space<vmem>>, %arg2: memref<1x128xf32, #tpu.memory_space<vmem>>, %arg3: memref<128x128xbf16, #tpu.memory_space<vmem>>, %arg4: memref<1x128xf32, #tpu.memory_space<vmem>>, %arg5: memref<128x128xbf16, #tpu.memory_space<vmem>>, %arg6: memref<1x128xf32, #tpu.memory_space<vmem>>, %arg7: memref<128x256xbf16, #tpu.memory_space<vmem>>, %arg8: memref<1x256xf32, #tpu.memory_space<vmem>>, %arg9: memref<8x128xf32, #tpu.memory_space<vmem>>, %arg10: memref<8x128xf32, #tpu.memory_space<vmem>>, %arg11: memref<8x128xf32, #tpu.memory_space<vmem>>, %arg12: memref<8x128xf32, #tpu.memory_space<vmem>>, %arg13: memref<8x256xf32, #tpu.memory_space<vmem>>) attributes {dimension_semantics = [], scalar_prefetch = 0 : i64, scratch_operands = 0 : i64, tpu.core_type = #tpu.core_type<tc>} {
    %c0 = arith.constant 0 : index
    %c0_0 = arith.constant 0 : index
    %0 = vector.load %arg0[%c0, %c0_0] : memref<8x256xf32, #tpu.memory_space<vmem>>, vector<8x256xf32>
    %1 = arith.truncf %0 : vector<8x256xf32> to vector<8x256xbf16>
    %c0_1 = arith.constant 0 : index
    %c0_2 = arith.constant 0 : index
    %2 = vector.load %arg1[%c0_1, %c0_2] : memref<256x128xbf16, #tpu.memory_space<vmem>>, vector<256x128xbf16>
    %cst = arith.constant dense<0.000000e+00> : vector<8x128xf32>
    %3 = tpu.matmul %1, %2, %cst {dimension_numbers = #tpu.dot_dimension_numbers<[1], [0], [0], [1], [0, 0, 1, 1], [], []>} : vector<8x256xbf16>, vector<256x128xbf16>, vector<8x128xf32> -> vector<8x128xf32>
    %c0_3 = arith.constant 0 : index
    %c0_4 = arith.constant 0 : index
    %4 = vector.load %arg2[%c0_3, %c0_4] : memref<1x128xf32, #tpu.memory_space<vmem>>, vector<1x128xf32>
    %5 = vector.broadcast %4 : vector<1x128xf32> to vector<8x128xf32>
    %6 = arith.addf %3, %5 : vector<8x128xf32>
    %cst_5 = arith.constant 0.000000e+00 : f32
    %7 = vector.broadcast %cst_5 : f32 to vector<8x128xf32>
    %8 = arith.maximumf %6, %7 : vector<8x128xf32>
    %c0_6 = arith.constant 0 : index
    %c0_7 = arith.constant 0 : index
    %9 = vector.load %arg10[%c0_6, %c0_7] : memref<8x128xf32, #tpu.memory_space<vmem>>, vector<8x128xf32>
    tpu.vector_store %arg10[%c0_6, %c0_7], %8 {strides = array<i32>} : memref<8x128xf32, #tpu.memory_space<vmem>>, vector<8x128xf32>,
    %10 = arith.truncf %8 : vector<8x128xf32> to vector<8x128xbf16>
    %c0_8 = arith.constant 0 : index
    %c0_9 = arith.constant 0 : index
    %11 = vector.load %arg3[%c0_8, %c0_9] : memref<128x128xbf16, #tpu.memory_space<vmem>>, vector<128x128xbf16>
    %cst_10 = arith.constant dense<0.000000e+00> : vector<8x128xf32>
    %12 = tpu.matmul %10, %11, %cst_10 {dimension_numbers = #tpu.dot_dimension_numbers<[1], [0], [0], [1], [0, 0, 1, 1], [], []>} : vector<8x128xbf16>, vector<128x128xbf16>, vector<8x128xf32> -> vector<8x128xf32>
    %c0_11 = arith.constant 0 : index
    %c0_12 = arith.constant 0 : index
    %13 = vector.load %arg4[%c0_11, %c0_12] : memref<1x128xf32, #tpu.memory_space<vmem>>, vector<1x128xf32>
    %14 = vector.broadcast %13 : vector<1x128xf32> to vector<8x128xf32>
    %15 = arith.addf %12, %14 : vector<8x128xf32>
    %c0_13 = arith.constant 0 : index
    %c0_14 = arith.constant 0 : index
    %16 = vector.load %arg5[%c0_13, %c0_14] : memref<128x128xbf16, #tpu.memory_space<vmem>>, vector<128x128xbf16>
    %cst_15 = arith.constant dense<0.000000e+00> : vector<8x128xf32>
    %17 = tpu.matmul %10, %16, %cst_15 {dimension_numbers = #tpu.dot_dimension_numbers<[1], [0], [0], [1], [0, 0, 1, 1], [], []>} : vector<8x128xbf16>, vector<128x128xbf16>, vector<8x128xf32> -> vector<8x128xf32>
    %c0_16 = arith.constant 0 : index
    %c0_17 = arith.constant 0 : index
    %18 = vector.load %arg6[%c0_16, %c0_17] : memref<1x128xf32, #tpu.memory_space<vmem>>, vector<1x128xf32>
    %19 = vector.broadcast %18 : vector<1x128xf32> to vector<8x128xf32>
    %20 = arith.addf %17, %19 : vector<8x128xf32>
    %c0_18 = arith.constant 0 : index
    %c0_19 = arith.constant 0 : index
    %21 = vector.load %arg11[%c0_18, %c0_19] : memref<8x128xf32, #tpu.memory_space<vmem>>, vector<8x128xf32>
    tpu.vector_store %arg11[%c0_18, %c0_19], %15 {strides = array<i32>} : memref<8x128xf32, #tpu.memory_space<vmem>>, vector<8x128xf32>,
    %c0_20 = arith.constant 0 : index
    %c0_21 = arith.constant 0 : index
    %22 = vector.load %arg12[%c0_20, %c0_21] : memref<8x128xf32, #tpu.memory_space<vmem>>, vector<8x128xf32>
    tpu.vector_store %arg12[%c0_20, %c0_21], %20 {strides = array<i32>} : memref<8x128xf32, #tpu.memory_space<vmem>>, vector<8x128xf32>,
    %c0_22 = arith.constant 0 : index
    %c0_23 = arith.constant 0 : index
    %23 = vector.load %arg9[%c0_22, %c0_23] : memref<8x128xf32, #tpu.memory_space<vmem>>, vector<8x128xf32>
    %cst_24 = arith.constant 5.000000e-01 : f32
    %24 = vector.broadcast %cst_24 : f32 to vector<8x128xf32>
    %25 = arith.mulf %24, %20 : vector<8x128xf32>
    %26 = math.exp %25 : vector<8x128xf32>
    %27 = arith.mulf %23, %26 : vector<8x128xf32>
    %28 = arith.addf %15, %27 : vector<8x128xf32>
    %29 = arith.truncf %28 : vector<8x128xf32> to vector<8x128xbf16>
    %c0_25 = arith.constant 0 : index
    %c0_26 = arith.constant 0 : index
    %30 = vector.load %arg7[%c0_25, %c0_26] : memref<128x256xbf16, #tpu.memory_space<vmem>>, vector<128x256xbf16>
    %cst_27 = arith.constant dense<0.000000e+00> : vector<8x256xf32>
    %31 = tpu.matmul %29, %30, %cst_27 {dimension_numbers = #tpu.dot_dimension_numbers<[1], [0], [0], [1], [0, 0, 1, 1], [], []>} : vector<8x128xbf16>, vector<128x256xbf16>, vector<8x256xf32> -> vector<8x256xf32>
    %c0_28 = arith.constant 0 : index
    %c0_29 = arith.constant 0 : index
    %32 = vector.load %arg8[%c0_28, %c0_29] : memref<1x256xf32, #tpu.memory_space<vmem>>, vector<1x256xf32>
    %33 = vector.broadcast %32 : vector<1x256xf32> to vector<8x256xf32>
    %34 = arith.addf %31, %33 : vector<8x256xf32>
    %cst_30 = arith.constant 0.000000e+00 : f32
    %35 = vector.broadcast %cst_30 : f32 to vector<8x256xf32>
    %36 = arith.maximumf %34, %35 : vector<8x256xf32>
    %c0_31 = arith.constant 0 : index
    %c0_32 = arith.constant 0 : index
    %37 = vector.load %arg13[%c0_31, %c0_32] : memref<8x256xf32, #tpu.memory_space<vmem>>, vector<8x256xf32>
    tpu.vector_store %arg13[%c0_31, %c0_32], %36 {strides = array<i32>} : memref<8x256xf32, #tpu.memory_space<vmem>>, vector<8x256xf32>,
    return
  }
}

module attributes {stable_mosaic.version = 11 : i64} {
  func.func @_linear_kernel(%arg0: i32, %arg1: i32, %arg2: memref<8x512xf32, #tpu.memory_space<vmem>>, %arg3: memref<512x384xbf16, #tpu.memory_space<vmem>>, %arg4: memref<1x384xf32, #tpu.memory_space<vmem>>, %arg5: memref<8x384xf32, #tpu.memory_space<vmem>>) attributes {dimension_semantics = [#tpu.dimension_semantics<parallel>, #tpu.dimension_semantics<arbitrary>], iteration_bounds = array<i64: 1, 1>, scalar_prefetch = 0 : i64, scratch_operands = 0 : i64, tpu.core_type = #tpu.core_type<tc>, window_params = [{pipeline_mode = #tpu.pipeline_mode<synchronous>, transform_indices = @transform_0, window_bounds = array<i64: 8, 512>}, {transform_indices = @transform_1, window_bounds = array<i64: 512, 384>}, {transform_indices = @transform_2, window_bounds = array<i64: 1, 384>}, {transform_indices = @transform_3, window_bounds = array<i64: 8, 384>}]} {
    %c0 = arith.constant 0 : index
    %c0_0 = arith.constant 0 : index
    %0 = vector.load %arg2[%c0, %c0_0] : memref<8x512xf32, #tpu.memory_space<vmem>>, vector<8x512xf32>
    %1 = arith.truncf %0 : vector<8x512xf32> to vector<8x512xbf16>
    %c0_1 = arith.constant 0 : index
    %c0_2 = arith.constant 0 : index
    %2 = vector.load %arg3[%c0_1, %c0_2] : memref<512x384xbf16, #tpu.memory_space<vmem>>, vector<512x384xbf16>
    %cst = arith.constant dense<0.000000e+00> : vector<8x384xf32>
    %3 = tpu.matmul %1, %2, %cst {dimension_numbers = #tpu.dot_dimension_numbers<[1], [0], [0], [1], [0, 0, 1, 1], [], []>} : vector<8x512xbf16>, vector<512x384xbf16>, vector<8x384xf32> -> vector<8x384xf32>
    %c0_3 = arith.constant 0 : index
    %c0_4 = arith.constant 0 : index
    %4 = vector.load %arg4[%c0_3, %c0_4] : memref<1x384xf32, #tpu.memory_space<vmem>>, vector<1x384xf32>
    %5 = vector.broadcast %4 : vector<1x384xf32> to vector<8x384xf32>
    %6 = arith.addf %3, %5 : vector<8x384xf32>
    %cst_5 = arith.constant 0.000000e+00 : f32
    %7 = vector.broadcast %cst_5 : f32 to vector<8x384xf32>
    %8 = arith.maximumf %6, %7 : vector<8x384xf32>
    %c0_6 = arith.constant 0 : index
    %c0_7 = arith.constant 0 : index
    %9 = vector.load %arg5[%c0_6, %c0_7] : memref<8x384xf32, #tpu.memory_space<vmem>>, vector<8x384xf32>
    tpu.vector_store %arg5[%c0_6, %c0_7], %8 {strides = array<i32>} : memref<8x384xf32, #tpu.memory_space<vmem>>, vector<8x384xf32>,
    return
  }
  func.func @transform_0(%arg0: i32, %arg1: i32) -> (i32, i32) {
    %c0_i32 = arith.constant 0 : i32
    %c0_i32_0 = arith.constant 0 : i32
    %c0_i32_1 = arith.constant 0 : i32
    return %c0_i32, %c0_i32_0 : i32, i32
  }
  func.func @transform_1(%arg0: i32, %arg1: i32) -> (i32, i32) {
    %c0_i32 = arith.constant 0 : i32
    return %arg1, %arg0 : i32, i32
  }
  func.func @transform_2(%arg0: i32, %arg1: i32) -> (i32, i32) {
    %c0_i32 = arith.constant 0 : i32
    %c0_i32_0 = arith.constant 0 : i32
    return %c0_i32, %arg0 : i32, i32
  }
  func.func @transform_3(%arg0: i32, %arg1: i32) -> (i32, i32) {
    %c0_i32 = arith.constant 0 : i32
    %c0_i32_0 = arith.constant 0 : i32
    return %c0_i32, %arg0 : i32, i32
  }
}

module attributes {stable_mosaic.version = 11 : i64} {
  func.func @_linear_kernel(%arg0: i32, %arg1: i32, %arg2: memref<8x384xf32, #tpu.memory_space<vmem>>, %arg3: memref<384x256xbf16, #tpu.memory_space<vmem>>, %arg4: memref<1x256xf32, #tpu.memory_space<vmem>>, %arg5: memref<8x256xf32, #tpu.memory_space<vmem>>) attributes {dimension_semantics = [#tpu.dimension_semantics<parallel>, #tpu.dimension_semantics<arbitrary>], iteration_bounds = array<i64: 1, 1>, scalar_prefetch = 0 : i64, scratch_operands = 0 : i64, tpu.core_type = #tpu.core_type<tc>, window_params = [{pipeline_mode = #tpu.pipeline_mode<synchronous>, transform_indices = @transform_0, window_bounds = array<i64: 8, 384>}, {transform_indices = @transform_1, window_bounds = array<i64: 384, 256>}, {transform_indices = @transform_2, window_bounds = array<i64: 1, 256>}, {transform_indices = @transform_3, window_bounds = array<i64: 8, 256>}]} {
    %c0 = arith.constant 0 : index
    %c0_0 = arith.constant 0 : index
    %0 = vector.load %arg2[%c0, %c0_0] : memref<8x384xf32, #tpu.memory_space<vmem>>, vector<8x384xf32>
    %1 = arith.truncf %0 : vector<8x384xf32> to vector<8x384xbf16>
    %c0_1 = arith.constant 0 : index
    %c0_2 = arith.constant 0 : index
    %2 = vector.load %arg3[%c0_1, %c0_2] : memref<384x256xbf16, #tpu.memory_space<vmem>>, vector<384x256xbf16>
    %cst = arith.constant dense<0.000000e+00> : vector<8x256xf32>
    %3 = tpu.matmul %1, %2, %cst {dimension_numbers = #tpu.dot_dimension_numbers<[1], [0], [0], [1], [0, 0, 1, 1], [], []>} : vector<8x384xbf16>, vector<384x256xbf16>, vector<8x256xf32> -> vector<8x256xf32>
    %c0_3 = arith.constant 0 : index
    %c0_4 = arith.constant 0 : index
    %4 = vector.load %arg4[%c0_3, %c0_4] : memref<1x256xf32, #tpu.memory_space<vmem>>, vector<1x256xf32>
    %5 = vector.broadcast %4 : vector<1x256xf32> to vector<8x256xf32>
    %6 = arith.addf %3, %5 : vector<8x256xf32>
    %cst_5 = arith.constant 0.000000e+00 : f32
    %7 = vector.broadcast %cst_5 : f32 to vector<8x256xf32>
    %8 = arith.maximumf %6, %7 : vector<8x256xf32>
    %c0_6 = arith.constant 0 : index
    %c0_7 = arith.constant 0 : index
    %9 = vector.load %arg5[%c0_6, %c0_7] : memref<8x256xf32, #tpu.memory_space<vmem>>, vector<8x256xf32>
    tpu.vector_store %arg5[%c0_6, %c0_7], %8 {strides = array<i32>} : memref<8x256xf32, #tpu.memory_space<vmem>>, vector<8x256xf32>,
    return
  }
  func.func @transform_0(%arg0: i32, %arg1: i32) -> (i32, i32) {
    %c0_i32 = arith.constant 0 : i32
    %c0_i32_0 = arith.constant 0 : i32
    %c0_i32_1 = arith.constant 0 : i32
    return %c0_i32, %c0_i32_0 : i32, i32
  }
  func.func @transform_1(%arg0: i32, %arg1: i32) -> (i32, i32) {
    %c0_i32 = arith.constant 0 : i32
    return %arg1, %arg0 : i32, i32
  }
  func.func @transform_2(%arg0: i32, %arg1: i32) -> (i32, i32) {
    %c0_i32 = arith.constant 0 : i32
    %c0_i32_0 = arith.constant 0 : i32
    return %c0_i32, %arg0 : i32, i32
  }
  func.func @transform_3(%arg0: i32, %arg1: i32) -> (i32, i32) {
    %c0_i32 = arith.constant 0 : i32
    %c0_i32_0 = arith.constant 0 : i32
    return %c0_i32, %arg0 : i32, i32
  }
}

module attributes {stable_mosaic.version = 11 : i64} {
  func.func @_linear_kernel(%arg0: i32, %arg1: i32, %arg2: memref<8x200xf32, #tpu.memory_space<vmem>>, %arg3: memref<200x512xbf16, #tpu.memory_space<vmem>>, %arg4: memref<1x512xf32, #tpu.memory_space<vmem>>, %arg5: memref<8x512xf32, #tpu.memory_space<vmem>>) attributes {dimension_semantics = [#tpu.dimension_semantics<parallel>, #tpu.dimension_semantics<arbitrary>], iteration_bounds = array<i64: 1, 1>, scalar_prefetch = 0 : i64, scratch_operands = 0 : i64, tpu.core_type = #tpu.core_type<tc>, window_params = [{pipeline_mode = #tpu.pipeline_mode<synchronous>, transform_indices = @transform_0, window_bounds = array<i64: 8, 200>}, {transform_indices = @transform_1, window_bounds = array<i64: 200, 512>}, {transform_indices = @transform_2, window_bounds = array<i64: 1, 512>}, {transform_indices = @transform_3, window_bounds = array<i64: 8, 512>}]} {
    %c0 = arith.constant 0 : index
    %c0_0 = arith.constant 0 : index
    %0 = vector.load %arg2[%c0, %c0_0] : memref<8x200xf32, #tpu.memory_space<vmem>>, vector<8x200xf32>
    %1 = arith.truncf %0 : vector<8x200xf32> to vector<8x200xbf16>
    %c0_1 = arith.constant 0 : index
    %c0_2 = arith.constant 0 : index
    %2 = vector.load %arg3[%c0_1, %c0_2] : memref<200x512xbf16, #tpu.memory_space<vmem>>, vector<200x512xbf16>
    %cst = arith.constant dense<0.000000e+00> : vector<8x512xf32>
    %3 = tpu.matmul %1, %2, %cst {dimension_numbers = #tpu.dot_dimension_numbers<[1], [0], [0], [1], [0, 0, 1, 1], [], []>} : vector<8x200xbf16>, vector<200x512xbf16>, vector<8x512xf32> -> vector<8x512xf32>
    %c0_3 = arith.constant 0 : index
    %c0_4 = arith.constant 0 : index
    %4 = vector.load %arg4[%c0_3, %c0_4] : memref<1x512xf32, #tpu.memory_space<vmem>>, vector<1x512xf32>
    %5 = vector.broadcast %4 : vector<1x512xf32> to vector<8x512xf32>
    %6 = arith.addf %3, %5 : vector<8x512xf32>
    %cst_5 = arith.constant 0.000000e+00 : f32
    %7 = vector.broadcast %cst_5 : f32 to vector<8x512xf32>
    %8 = arith.maximumf %6, %7 : vector<8x512xf32>
    %c0_6 = arith.constant 0 : index
    %c0_7 = arith.constant 0 : index
    %9 = vector.load %arg5[%c0_6, %c0_7] : memref<8x512xf32, #tpu.memory_space<vmem>>, vector<8x512xf32>
    tpu.vector_store %arg5[%c0_6, %c0_7], %8 {strides = array<i32>} : memref<8x512xf32, #tpu.memory_space<vmem>>, vector<8x512xf32>,
    return
  }
  func.func @transform_0(%arg0: i32, %arg1: i32) -> (i32, i32) {
    %c0_i32 = arith.constant 0 : i32
    %c0_i32_0 = arith.constant 0 : i32
    %c0_i32_1 = arith.constant 0 : i32
    return %c0_i32, %c0_i32_0 : i32, i32
  }
  func.func @transform_1(%arg0: i32, %arg1: i32) -> (i32, i32) {
    %c0_i32 = arith.constant 0 : i32
    return %arg1, %arg0 : i32, i32
  }
  func.func @transform_2(%arg0: i32, %arg1: i32) -> (i32, i32) {
    %c0_i32 = arith.constant 0 : i32
    %c0_i32_0 = arith.constant 0 : i32
    return %c0_i32, %arg0 : i32, i32
  }
  func.func @transform_3(%arg0: i32, %arg1: i32) -> (i32, i32) {
    %c0_i32 = arith.constant 0 : i32
    %c0_i32_0 = arith.constant 0 : i32
    return %c0_i32, %arg0 : i32, i32
  }
}

module attributes {stable_mosaic.version = 11 : i64} {
  func.func @_linear_kernel(%arg0: i32, %arg1: i32, %arg2: memref<8x256xf32, #tpu.memory_space<vmem>>, %arg3: memref<256x384xbf16, #tpu.memory_space<vmem>>, %arg4: memref<1x384xf32, #tpu.memory_space<vmem>>, %arg5: memref<8x384xf32, #tpu.memory_space<vmem>>) attributes {dimension_semantics = [#tpu.dimension_semantics<parallel>, #tpu.dimension_semantics<arbitrary>], iteration_bounds = array<i64: 1, 1>, scalar_prefetch = 0 : i64, scratch_operands = 0 : i64, tpu.core_type = #tpu.core_type<tc>, window_params = [{pipeline_mode = #tpu.pipeline_mode<synchronous>, transform_indices = @transform_0, window_bounds = array<i64: 8, 256>}, {transform_indices = @transform_1, window_bounds = array<i64: 256, 384>}, {transform_indices = @transform_2, window_bounds = array<i64: 1, 384>}, {transform_indices = @transform_3, window_bounds = array<i64: 8, 384>}]} {
    %c0 = arith.constant 0 : index
    %c0_0 = arith.constant 0 : index
    %0 = vector.load %arg2[%c0, %c0_0] : memref<8x256xf32, #tpu.memory_space<vmem>>, vector<8x256xf32>
    %1 = arith.truncf %0 : vector<8x256xf32> to vector<8x256xbf16>
    %c0_1 = arith.constant 0 : index
    %c0_2 = arith.constant 0 : index
    %2 = vector.load %arg3[%c0_1, %c0_2] : memref<256x384xbf16, #tpu.memory_space<vmem>>, vector<256x384xbf16>
    %cst = arith.constant dense<0.000000e+00> : vector<8x384xf32>
    %3 = tpu.matmul %1, %2, %cst {dimension_numbers = #tpu.dot_dimension_numbers<[1], [0], [0], [1], [0, 0, 1, 1], [], []>} : vector<8x256xbf16>, vector<256x384xbf16>, vector<8x384xf32> -> vector<8x384xf32>
    %c0_3 = arith.constant 0 : index
    %c0_4 = arith.constant 0 : index
    %4 = vector.load %arg4[%c0_3, %c0_4] : memref<1x384xf32, #tpu.memory_space<vmem>>, vector<1x384xf32>
    %5 = vector.broadcast %4 : vector<1x384xf32> to vector<8x384xf32>
    %6 = arith.addf %3, %5 : vector<8x384xf32>
    %cst_5 = arith.constant 0.000000e+00 : f32
    %7 = vector.broadcast %cst_5 : f32 to vector<8x384xf32>
    %8 = arith.maximumf %6, %7 : vector<8x384xf32>
    %c0_6 = arith.constant 0 : index
    %c0_7 = arith.constant 0 : index
    %9 = vector.load %arg5[%c0_6, %c0_7] : memref<8x384xf32, #tpu.memory_space<vmem>>, vector<8x384xf32>
    tpu.vector_store %arg5[%c0_6, %c0_7], %8 {strides = array<i32>} : memref<8x384xf32, #tpu.memory_space<vmem>>, vector<8x384xf32>,
    return
  }
  func.func @transform_0(%arg0: i32, %arg1: i32) -> (i32, i32) {
    %c0_i32 = arith.constant 0 : i32
    %c0_i32_0 = arith.constant 0 : i32
    %c0_i32_1 = arith.constant 0 : i32
    return %c0_i32, %c0_i32_0 : i32, i32
  }
  func.func @transform_1(%arg0: i32, %arg1: i32) -> (i32, i32) {
    %c0_i32 = arith.constant 0 : i32
    return %arg1, %arg0 : i32, i32
  }
  func.func @transform_2(%arg0: i32, %arg1: i32) -> (i32, i32) {
    %c0_i32 = arith.constant 0 : i32
    %c0_i32_0 = arith.constant 0 : i32
    return %c0_i32, %arg0 : i32, i32
  }
  func.func @transform_3(%arg0: i32, %arg1: i32) -> (i32, i32) {
    %c0_i32 = arith.constant 0 : i32
    %c0_i32_0 = arith.constant 0 : i32
    return %c0_i32, %arg0 : i32, i32
  }
}

module attributes {stable_mosaic.version = 11 : i64} {
  func.func @_linear_kernel(%arg0: i32, %arg1: i32, %arg2: memref<8x384xf32, #tpu.memory_space<vmem>>, %arg3: memref<384x512xbf16, #tpu.memory_space<vmem>>, %arg4: memref<1x512xf32, #tpu.memory_space<vmem>>, %arg5: memref<8x512xf32, #tpu.memory_space<vmem>>) attributes {dimension_semantics = [#tpu.dimension_semantics<parallel>, #tpu.dimension_semantics<arbitrary>], iteration_bounds = array<i64: 1, 1>, scalar_prefetch = 0 : i64, scratch_operands = 0 : i64, tpu.core_type = #tpu.core_type<tc>, window_params = [{pipeline_mode = #tpu.pipeline_mode<synchronous>, transform_indices = @transform_0, window_bounds = array<i64: 8, 384>}, {transform_indices = @transform_1, window_bounds = array<i64: 384, 512>}, {transform_indices = @transform_2, window_bounds = array<i64: 1, 512>}, {transform_indices = @transform_3, window_bounds = array<i64: 8, 512>}]} {
    %c0 = arith.constant 0 : index
    %c0_0 = arith.constant 0 : index
    %0 = vector.load %arg2[%c0, %c0_0] : memref<8x384xf32, #tpu.memory_space<vmem>>, vector<8x384xf32>
    %1 = arith.truncf %0 : vector<8x384xf32> to vector<8x384xbf16>
    %c0_1 = arith.constant 0 : index
    %c0_2 = arith.constant 0 : index
    %2 = vector.load %arg3[%c0_1, %c0_2] : memref<384x512xbf16, #tpu.memory_space<vmem>>, vector<384x512xbf16>
    %cst = arith.constant dense<0.000000e+00> : vector<8x512xf32>
    %3 = tpu.matmul %1, %2, %cst {dimension_numbers = #tpu.dot_dimension_numbers<[1], [0], [0], [1], [0, 0, 1, 1], [], []>} : vector<8x384xbf16>, vector<384x512xbf16>, vector<8x512xf32> -> vector<8x512xf32>
    %c0_3 = arith.constant 0 : index
    %c0_4 = arith.constant 0 : index
    %4 = vector.load %arg4[%c0_3, %c0_4] : memref<1x512xf32, #tpu.memory_space<vmem>>, vector<1x512xf32>
    %5 = vector.broadcast %4 : vector<1x512xf32> to vector<8x512xf32>
    %6 = arith.addf %3, %5 : vector<8x512xf32>
    %cst_5 = arith.constant 0.000000e+00 : f32
    %7 = vector.broadcast %cst_5 : f32 to vector<8x512xf32>
    %8 = arith.maximumf %6, %7 : vector<8x512xf32>
    %c0_6 = arith.constant 0 : index
    %c0_7 = arith.constant 0 : index
    %9 = vector.load %arg5[%c0_6, %c0_7] : memref<8x512xf32, #tpu.memory_space<vmem>>, vector<8x512xf32>
    tpu.vector_store %arg5[%c0_6, %c0_7], %8 {strides = array<i32>} : memref<8x512xf32, #tpu.memory_space<vmem>>, vector<8x512xf32>,
    return
  }
  func.func @transform_0(%arg0: i32, %arg1: i32) -> (i32, i32) {
    %c0_i32 = arith.constant 0 : i32
    %c0_i32_0 = arith.constant 0 : i32
    %c0_i32_1 = arith.constant 0 : i32
    return %c0_i32, %c0_i32_0 : i32, i32
  }
  func.func @transform_1(%arg0: i32, %arg1: i32) -> (i32, i32) {
    %c0_i32 = arith.constant 0 : i32
    return %arg1, %arg0 : i32, i32
  }
  func.func @transform_2(%arg0: i32, %arg1: i32) -> (i32, i32) {
    %c0_i32 = arith.constant 0 : i32
    %c0_i32_0 = arith.constant 0 : i32
    return %c0_i32, %arg0 : i32, i32
  }
  func.func @transform_3(%arg0: i32, %arg1: i32) -> (i32, i32) {
    %c0_i32 = arith.constant 0 : i32
    %c0_i32_0 = arith.constant 0 : i32
    return %c0_i32, %arg0 : i32, i32
  }
}

module attributes {stable_mosaic.version = 11 : i64} {
  func.func @_linear_kernel(%arg0: i32, %arg1: i32, %arg2: memref<8x512xf32, #tpu.memory_space<vmem>>, %arg3: memref<512x256xbf16, #tpu.memory_space<vmem>>, %arg4: memref<1x256xf32, #tpu.memory_space<vmem>>, %arg5: memref<8x256xf32, #tpu.memory_space<vmem>>) attributes {dimension_semantics = [#tpu.dimension_semantics<parallel>, #tpu.dimension_semantics<arbitrary>], iteration_bounds = array<i64: 1, 1>, scalar_prefetch = 0 : i64, scratch_operands = 0 : i64, tpu.core_type = #tpu.core_type<tc>, window_params = [{pipeline_mode = #tpu.pipeline_mode<synchronous>, transform_indices = @transform_0, window_bounds = array<i64: 8, 512>}, {transform_indices = @transform_1, window_bounds = array<i64: 512, 256>}, {transform_indices = @transform_2, window_bounds = array<i64: 1, 256>}, {transform_indices = @transform_3, window_bounds = array<i64: 8, 256>}]} {
    %c0 = arith.constant 0 : index
    %c0_0 = arith.constant 0 : index
    %0 = vector.load %arg2[%c0, %c0_0] : memref<8x512xf32, #tpu.memory_space<vmem>>, vector<8x512xf32>
    %1 = arith.truncf %0 : vector<8x512xf32> to vector<8x512xbf16>
    %c0_1 = arith.constant 0 : index
    %c0_2 = arith.constant 0 : index
    %2 = vector.load %arg3[%c0_1, %c0_2] : memref<512x256xbf16, #tpu.memory_space<vmem>>, vector<512x256xbf16>
    %cst = arith.constant dense<0.000000e+00> : vector<8x256xf32>
    %3 = tpu.matmul %1, %2, %cst {dimension_numbers = #tpu.dot_dimension_numbers<[1], [0], [0], [1], [0, 0, 1, 1], [], []>} : vector<8x512xbf16>, vector<512x256xbf16>, vector<8x256xf32> -> vector<8x256xf32>
    %c0_3 = arith.constant 0 : index
    %c0_4 = arith.constant 0 : index
    %4 = vector.load %arg4[%c0_3, %c0_4] : memref<1x256xf32, #tpu.memory_space<vmem>>, vector<1x256xf32>
    %5 = vector.broadcast %4 : vector<1x256xf32> to vector<8x256xf32>
    %6 = arith.addf %3, %5 : vector<8x256xf32>
    %c0_5 = arith.constant 0 : index
    %c0_6 = arith.constant 0 : index
    %7 = vector.load %arg5[%c0_5, %c0_6] : memref<8x256xf32, #tpu.memory_space<vmem>>, vector<8x256xf32>
    tpu.vector_store %arg5[%c0_5, %c0_6], %6 {strides = array<i32>} : memref<8x256xf32, #tpu.memory_space<vmem>>, vector<8x256xf32>,
    return
  }
  func.func @transform_0(%arg0: i32, %arg1: i32) -> (i32, i32) {
    %c0_i32 = arith.constant 0 : i32
    %c0_i32_0 = arith.constant 0 : i32
    %c0_i32_1 = arith.constant 0 : i32
    return %c0_i32, %c0_i32_0 : i32, i32
  }
  func.func @transform_1(%arg0: i32, %arg1: i32) -> (i32, i32) {
    %c0_i32 = arith.constant 0 : i32
    return %arg1, %arg0 : i32, i32
  }
  func.func @transform_2(%arg0: i32, %arg1: i32) -> (i32, i32) {
    %c0_i32 = arith.constant 0 : i32
    %c0_i32_0 = arith.constant 0 : i32
    return %c0_i32, %arg0 : i32, i32
  }
  func.func @transform_3(%arg0: i32, %arg1: i32) -> (i32, i32) {
    %c0_i32 = arith.constant 0 : i32
    %c0_i32_0 = arith.constant 0 : i32
    return %c0_i32, %arg0 : i32, i32
  }
}

</mosaic_0001>

<bundles_post_ra>
// kernel: vae_forward.9
= control target key start
LH: loop header
LB: loop body
LE: loop exit
PB: predicated region body
PF: predicated region fallthrough
CT: control target
= control target key end

     0   :  { %v536_v1 = vmov 0   ;;  %v71_v59 = vlaneseq  ;;  %s719_s1 = inlined_call_operand.vmem [shape: bf16[384,256], index: 1, kind: input, shape index: {}]   ;;  %s720_s0 = inlined_call_operand.vmem [shape: f32[8,384], index: 0, kind: input, shape index: {}]   ;;  %s721_s2 = inlined_call_operand.vmem [shape: f32[1,256], index: 2, kind: input, shape index: {}]   ;;  %s722_s3 = inlined_call_operand.vmem [shape: f32[8,256], index: 3, kind: output, shape index: {}]  }
   0x1   :  { %v464_v0 = vld [vmem:[%s719_s1 + $0x4] ss:$8 sps:$4 sm:$0xff]   ;;  %394 = vmatprep.mubr.bf16.mxu0 %v536_v1  ;;  %v466_v2 = vld [vmem:[%s719_s1] ss:$8 sps:$4 sm:$0xff]   ;;  %v467_v3 = vld [vmem:[%s719_s1 + $0x14] ss:$8 sps:$4 sm:$0xff]  }
   0x2   :  { %321 = vmatprep.subr.bf16.mxu1 %v464_v0  ;;  %v469_v4 = vld [vmem:[%s719_s1 + $0x10] ss:$8 sps:$4 sm:$0xff]   ;;  %v470_v5 = vld [vmem:[%s719_s1 + $0x24] ss:$8 sps:$4 sm:$0xff]   ;;  %v472_v6 = vld [vmem:[%s719_s1 + $0x20] ss:$8 sps:$4 sm:$0xff]  }
   0x3   :  { %322 = vmatpush1.bf16.msra.mxu1 %v466_v2  ;;  %v473_v7 = vld [vmem:[%s719_s1 + $0x34] ss:$8 sps:$4 sm:$0xff]   ;;  %v475_v8 = vld [vmem:[%s719_s1 + $0x30] ss:$8 sps:$4 sm:$0xff]   ;;  %v488_v9 = vld [vmem:[%s719_s1 + $0x104] ss:$8 sps:$4 sm:$0xff]  }
   0x4   :  { %323 = vmatprep.subr.bf16.mxu1 %v467_v3  ;;  %v476_v10 = vld [vmem:[%s719_s1 + $0x44] ss:$8 sps:$4 sm:$0xff]   ;;  %v492_v11 = vld [vmem:[%s719_s1 + $0x100] ss:$8 sps:$4 sm:$0xff]   ;;  %362 = vmatprep.subr.bf16.mxu0 %v488_v9  ;;  %v494_v12 = vld [vmem:[%s719_s1 + $0x114] ss:$8 sps:$4 sm:$0xff]  }
   0x5   :  { %363 = vmatpush1.bf16.msra.mxu0 %v492_v11  ;;  %v478_v13 = vld [vmem:[%s719_s1 + $0x40] ss:$8 sps:$4 sm:$0xff]   ;;  %v479_v14 = vld [vmem:[%s719_s1 + $0x54] ss:$8 sps:$4 sm:$0xff]   ;;  %v498_v15 = vld [vmem:[%s719_s1 + $0x110] ss:$8 sps:$4 sm:$0xff]  }
   0x6   :  { %364 = vmatprep.subr.bf16.mxu0 %v494_v12  ;;  %v500_v16 = vld [vmem:[%s719_s1 + $0x124] ss:$8 sps:$4 sm:$0xff]   ;;  %v481_v17 = vld [vmem:[%s719_s1 + $0x50] ss:$8 sps:$4 sm:$0xff]   ;;  %v504_v18 = vld [vmem:[%s719_s1 + $0x120] ss:$8 sps:$4 sm:$0xff]  }
   0x7   :  { %324 = vmatpush1.bf16.msra.mxu1 %v469_v4  ;;  %v506_v19 = vld [vmem:[%s719_s1 + $0x134] ss:$8 sps:$4 sm:$0xff]   ;;  %v482_v20 = vld [vmem:[%s719_s1 + $0x64] ss:$8 sps:$4 sm:$0xff]   ;;  %v510_v21 = vld [vmem:[%s719_s1 + $0x130] ss:$8 sps:$4 sm:$0xff]  }
   0x8   :  { %325 = vmatprep.subr.bf16.mxu1 %v470_v5  ;;  %v484_v22 = vld [vmem:[%s719_s1 + $0x60] ss:$8 sps:$4 sm:$0xff]   ;;  %v512_v23 = vld [vmem:[%s719_s1 + $0x144] ss:$8 sps:$4 sm:$0xff]   ;;  %v485_v24 = vld [vmem:[%s719_s1 + $0x74] ss:$8 sps:$4 sm:$0xff]  }
   0x9   :  { %365 = vmatpush1.bf16.msra.mxu0 %v498_v15  ;;  %v487_v25 = vld [vmem:[%s719_s1 + $0x70] ss:$8 sps:$4 sm:$0xff]   ;;  %v516_v26 = vld [vmem:[%s719_s1 + $0x140] ss:$8 sps:$4 sm:$0xff]   ;;  %v518_v27 = vld [vmem:[%s719_s1 + $0x154] ss:$8 sps:$4 sm:$0xff]  }
   0xa   :  { %366 = vmatprep.subr.bf16.mxu0 %v500_v16  ;;  %v490_v28 = vld [vmem:[%s719_s1 + $0x84] ss:$8 sps:$4 sm:$0xff]   ;;  %v522_v29 = vld [vmem:[%s719_s1 + $0x150] ss:$8 sps:$4 sm:$0xff]   ;;  %v493_v30 = vld [vmem:[%s719_s1 + $0x80] ss:$8 sps:$4 sm:$0xff]  }
   0xb   :  { %326 = vmatpush1.bf16.msra.mxu1 %v472_v6  ;;  %v524_v31 = vld [vmem:[%s719_s1 + $0x164] ss:$8 sps:$4 sm:$0xff]   ;;  %v496_v32 = vld [vmem:[%s719_s1 + $0x94] ss:$8 sps:$4 sm:$0xff]   ;;  %v528_v35 = vld [vmem:[%s719_s1 + $0x160] ss:$8 sps:$4 sm:$0xff]  }
   0xc   :  { %327 = vmatprep.subr.bf16.mxu1 %v473_v7  ;;  %v16_v33 = vld [vmem:[%s720_s0 + $0x8] sm:$0xff]  ;;  %v499_v36 = vld [vmem:[%s719_s1 + $0x90] ss:$8 sps:$4 sm:$0xff]   ;;  %v530_v37 = vld [vmem:[%s719_s1 + $0x174] ss:$8 sps:$4 sm:$0xff]   ;;  %v72_v60 = vshrl.u32 %v71_v59, 7 }
   0xd   :  { %367 = vmatpush1.bf16.msra.mxu0 %v504_v18  ;;  %v19_v34 = vpack.c.bf16 %v16_v33, %v16_v33  ;;  %v502_v38 = vld [vmem:[%s719_s1 + $0xa4] ss:$8 sps:$4 sm:$0xff]   ;;  %v534_v39 = vld [vmem:[%s719_s1 + $0x170] ss:$8 sps:$4 sm:$0xff]   ;;  %v505_v41 = vld [vmem:[%s719_s1 + $0xa0] ss:$8 sps:$4 sm:$0xff]  }
   0xe   :  { %368 = vmatprep.subr.bf16.mxu0 %v506_v19  ;;  %v17_v40 = vld [vmem:[%s720_s0 + $0x10] sm:$0xff]  ;;  %v514_v45 = vld [vmem:[%s719_s1 + $0xc4] ss:$8 sps:$4 sm:$0xff]   ;;  %v517_v46 = vld [vmem:[%s719_s1 + $0xc0] ss:$8 sps:$4 sm:$0xff]   ;;  %v73_v61 = vsub.s32 0, %v72_v60 }
   0xf   :  { %328 = vmatpush1.bf16.msra.mxu1 %v475_v8  ;;  %353 = vmatprep.mubr.bf16.mxu1 %v19_v34  ;;  %v508_v42 = vld [vmem:[%s719_s1 + $0xb4] ss:$8 sps:$4 sm:$0xff]   ;;  %v20_v43 = vpack.c.bf16 %v17_v40, %v17_v40  ;;  %v511_v44 = vld [vmem:[%s719_s1 + $0xb0] ss:$8 sps:$4 sm:$0xff]   ;;  %v526_v49 = vld [vmem:[%s719_s1 + $0xe4] ss:$8 sps:$4 sm:$0xff]  }
  0x10   :  { %329 = vmatprep.subr.bf16.mxu1 %v476_v10  ;;  %v520_v47 = vld [vmem:[%s719_s1 + $0xd4] ss:$8 sps:$4 sm:$0xff]   ;;  %v523_v48 = vld [vmem:[%s719_s1 + $0xd0] ss:$8 sps:$4 sm:$0xff]   ;;  %v529_v50 = vld [vmem:[%s719_s1 + $0xe0] ss:$8 sps:$4 sm:$0xff]  }
  0x11   :  { %369 = vmatpush1.bf16.msra.mxu0 %v510_v21  ;;  %v532_v51 = vld [vmem:[%s719_s1 + $0xf4] ss:$8 sps:$4 sm:$0xff]   ;;  %v535_v52 = vld [vmem:[%s719_s1 + $0xf0] ss:$8 sps:$4 sm:$0xff]   ;;  %v15_v53 = vld [vmem:[%s720_s0] sm:$0xff]  ;;  %v77_v63 = vsub.s32 1, %v72_v60 }
  0x12   :  { %370 = vmatprep.subr.bf16.mxu0 %v512_v23  ;;  %v18_v54 = vpack.c.bf16 %v15_v53, %v15_v53  ;;  %v69_v62 = vld [vmem:[%s721_s2] sm:$0x3] }
  0x13   :  { %330 = vmatpush1.bf16.msra.mxu1 %v478_v13  ;;  %v74_v0 = vrot.slane %v69_v62, %v73_v61  ;;  %v78_v1 = vrot.slane %v69_v62, %v77_v63 }
  0x14   :  { %331 = vmatprep.subr.bf16.mxu1 %v479_v14 }
  0x15   :  { %371 = vmatpush1.bf16.msra.mxu0 %v516_v26 }
  0x16   :  { %372 = vmatprep.subr.bf16.mxu0 %v518_v27 }
  0x17   :  { %332 = vmatpush1.bf16.msra.mxu1 %v481_v17 }
  0x18   :  { %333 = vmatprep.subr.bf16.mxu1 %v482_v20 }
  0x19   :  { %373 = vmatpush1.bf16.msra.mxu0 %v522_v29 }
  0x1a   :  { %374 = vmatprep.subr.bf16.mxu0 %v524_v31 }
  0x1b   :  { %334 = vmatpush1.bf16.msra.mxu1 %v484_v22 }
  0x1c   :  { %335 = vmatprep.subr.bf16.mxu1 %v485_v24 }
  0x1d   :  { %375 = vmatpush1.bf16.msra.mxu0 %v528_v35 }
  0x1e   :  { %376 = vmatprep.subr.bf16.mxu0 %v530_v37 }
  0x1f   :  { %336 = vmatpush1.bf16.msra.mxu1 %v487_v25 }
  0x20   :  { %337 = vmatprep.subr.bf16.mxu1 %v490_v28 }
  0x21   :  { %377 = vmatpush1.bf16.msra.mxu0 %v534_v39 }
  0x23   :  { %338 = vmatpush1.bf16.msra.mxu1 %v493_v30 }
  0x24   :  { %339 = vmatprep.subr.bf16.mxu1 %v496_v32  ;;  %395 = vmatmul.mubr.bf16.vlgmr.msra.gmra.mrb[0].mxu0 %v20_v43 }
  0x27   :  { %340 = vmatpush1.bf16.msra.mxu1 %v499_v36 }
  0x28   :  { %341 = vmatprep.subr.bf16.mxu1 %v502_v38 }
  0x2b   :  { %342 = vmatpush1.bf16.msra.mxu1 %v505_v41 }
  0x2c   :  { %343 = vmatprep.subr.bf16.mxu1 %v508_v42 }
  0x2f   :  { %344 = vmatpush1.bf16.msra.mxu1 %v511_v44 }
  0x30   :  { %345 = vmatprep.subr.bf16.mxu1 %v514_v45 }
  0x33   :  { %346 = vmatpush1.bf16.msra.mxu1 %v517_v46 }
  0x34   :  { %347 = vmatprep.subr.bf16.mxu1 %v520_v47 }
  0x37   :  { %348 = vmatpush1.bf16.msra.mxu1 %v523_v48 }
  0x38   :  { %349 = vmatprep.subr.bf16.mxu1 %v526_v49 }
  0x3b   :  { %350 = vmatpush1.bf16.msra.mxu1 %v529_v50 }
  0x3c   :  { %351 = vmatprep.subr.bf16.mxu1 %v532_v51 }
  0x3f   :  { %352 = vmatpush1.bf16.msra.mxu1 %v535_v52 }
  0x42   :  { %354 = vmatmul.mubr.bf16.vlgmr.msra.gmra.mrb[0].mxu1 %v18_v54 }
  0xf7   :  { %v396_v55 = vpop.f32.mrb[0].mxu0 }
  0xf8   :  { %v398_v56 = vpop.f32.mrb[1].mxu0 }
  0xf9   :  { %v400_v57 = vpop.f32.mrb[2].mxu0 }
  0xfa   :  { %v401_v58 = vpop.f32.mrb[3].mxu0 }
 0x115   :  { %v355_v2 = vpop.f32.mrb[0].mxu1 }
 0x116   :  { %v356_v3 = vadd.f32 %v355_v2, %v74_v0  ;;  %v357_v4 = vpop.f32.mrb[1].mxu1 }
 0x117   :  { %v358_v5 = vadd.f32 %v357_v4, %v78_v1  ;;  %v359_v6 = vpop.f32.mrb[2].mxu1 }
 0x118   :  { %v397_v7 = vadd.f32 %v396_v55, %v356_v3  ;;  %v360_v8 = vpop.f32.mrb[3].mxu1 }
 0x119   :  { %v399_v9 = vadd.f32 %v398_v56, %v358_v5 }
 0x11a   :  { %v403_v10 = vmax.f32 %v397_v7, 0.0 }
 0x11b   :  { %v404_v11 = vmax.f32 %v399_v9, 0.0 }
 0x11c   :  { %405 = vst [vmem:[%s722_s3] sm:$0xff] %v403_v10 }
 0x11d   :  { %406 = vst [vmem:[%s722_s3 + $0x8] sm:$0xff] %v404_v11 }

// kernel: vae_forward.7
= control target key start
LH: loop header
LB: loop body
LE: loop exit
PB: predicated region body
PF: predicated region fallthrough
CT: control target
= control target key end

     0   :  { %8 = vsyncpa [#allocation3], 0  ;;  %s626_s12 = smov [#allocation2]   ;;  %s682_s0 = inlined_call_operand.vmem [shape: f32[8,200], index: 0, kind: input, shape index: {}]   ;;  %s683_s1 = inlined_call_operand.hbm [shape: bf16[200,512], index: 1, kind: input, shape index: {}]   ;;  %s684_s2 = inlined_call_operand.vmem [shape: f32[1,512], index: 2, kind: input, shape index: {}]   ;;  %s685_s3 = inlined_call_operand.vmem [shape: f32[8,512], index: 3, kind: output, shape index: {}]  }
   0x1   :  { %s16_s13 = sshll.u32 %s626_s12, 4  ;;  %s602_s16 = scalar_lea.hbm %s683_s1, 6400  ;;  %s17_s13 = int_to_ptr.vmem [resolvable:$true] %s16_s13 }
   0x2   :  { %p603_p0 = scmp.ne.s32.totalorder %s683_s1, %s602_s16  ;;  %p606_p1 = scmp.lt.u32.totalorder %s602_s16, %s683_s1 }
   0x4   :  { %p608_p2 = pnand %p606_p1, %p603_p0 }
   0x6   :  { %611 = shalt.err (!%p608_p2)
}
   0x7   :  { %s612_s21 = scalar_lea.vmem %s17_s13, 6400  ;;  %p617_p4 = scmp.lt.s32.totalorder %s17_s13, %s17_s13 }
   0x8   :  { %p613_p3 = scmp.ne.s32.totalorder %s17_s13, %s612_s21  ;;  %p618_p5 = scmp.lt.s32.totalorder %s612_s21, %s612_s21 }
   0xa   :  { %p619_p6 = por %p618_p5, %p617_p4 }
   0xc   :  { %p620_p7 = pnand %p619_p6, %p613_p3 }
   0xe   :  { %623 = shalt.err (!%p620_p7)
}
   0xf   :  { %s627_s22 = smov 256   ;;  %s628_s23 = smov 16  }
  0x10   :  { %22 = dma.hbm_to_vmem [thread:$0]  %s683_s1, 6400, %s17_s13, [#allocation3], %s627_s22, %s627_s22, %s628_s23  }
  0x11   :  { %624 = dma.done.wait [#allocation3], 6400  }
  0x12   :  { %625 = vsyncadd [#allocation3], 4294960896  ;;  %v526_v0 = vld [vmem:[#allocation2 + $0x4] ss:$16 sps:$4 sm:$0xff]   ;;  %v528_v1 = vld [vmem:[#allocation2 + $0xc] ss:$16 sps:$4 sm:$0xff]   ;;  %v85_v60 = vlaneseq }
  0x13   :  { %372 = vmatprep.subr.bf16.mxu0 %v526_v0  ;;  %v530_v2 = vld [vmem:[#allocation2] ss:$16 sps:$4 sm:$0xff]   ;;  %v531_v3 = vld [vmem:[#allocation2 + $0x8] ss:$16 sps:$4 sm:$0xff]   ;;  %413 = vmatprep.subr.bf16.mxu1 %v528_v1  ;;  %v532_v4 = vld [vmem:[#allocation2 + $0x24] ss:$16 sps:$4 sm:$0xff]  }
  0x14   :  { %373 = vmatpush1.bf16.msra.mxu0 %v530_v2  ;;  %414 = vmatpush1.bf16.msra.mxu1 %v531_v3  ;;  %v534_v5 = vld [vmem:[#allocation2 + $0x2c] ss:$16 sps:$4 sm:$0xff]   ;;  %v536_v6 = vld [vmem:[#allocation2 + $0x20] ss:$16 sps:$4 sm:$0xff]   ;;  %v537_v7 = vld [vmem:[#allocation2 + $0x28] ss:$16 sps:$4 sm:$0xff]  }
  0x15   :  { %374 = vmatprep.subr.bf16.mxu0 %v532_v4  ;;  %415 = vmatprep.subr.bf16.mxu1 %v534_v5  ;;  %v538_v8 = vld [vmem:[#allocation2 + $0x44] ss:$16 sps:$4 sm:$0xff]   ;;  %v540_v9 = vld [vmem:[#allocation2 + $0x4c] ss:$16 sps:$4 sm:$0xff]   ;;  %v542_v10 = vld [vmem:[#allocation2 + $0x40] ss:$16 sps:$4 sm:$0xff]  }
  0x16   :  { %v543_v11 = vld [vmem:[#allocation2 + $0x48] ss:$16 sps:$4 sm:$0xff]   ;;  %v544_v12 = vld [vmem:[#allocation2 + $0x64] ss:$16 sps:$4 sm:$0xff]   ;;  %v546_v13 = vld [vmem:[#allocation2 + $0x6c] ss:$16 sps:$4 sm:$0xff]  }
  0x17   :  { %v548_v14 = vld [vmem:[#allocation2 + $0x60] ss:$16 sps:$4 sm:$0xff]   ;;  %v549_v15 = vld [vmem:[#allocation2 + $0x68] ss:$16 sps:$4 sm:$0xff]   ;;  %v550_v16 = vld [vmem:[#allocation2 + $0x84] ss:$16 sps:$4 sm:$0xff]  }
  0x18   :  { %375 = vmatpush1.bf16.msra.mxu0 %v536_v6  ;;  %416 = vmatpush1.bf16.msra.mxu1 %v537_v7  ;;  %v552_v17 = vld [vmem:[#allocation2 + $0x8c] ss:$16 sps:$4 sm:$0xff]   ;;  %v554_v18 = vld [vmem:[#allocation2 + $0x80] ss:$16 sps:$4 sm:$0xff]   ;;  %v555_v19 = vld [vmem:[#allocation2 + $0x88] ss:$16 sps:$4 sm:$0xff]  }
  0x19   :  { %376 = vmatprep.subr.bf16.mxu0 %v538_v8  ;;  %417 = vmatprep.subr.bf16.mxu1 %v540_v9  ;;  %v556_v20 = vld [vmem:[#allocation2 + $0xa4] ss:$16 sps:$4 sm:$0xff]   ;;  %v558_v21 = vld [vmem:[#allocation2 + $0xac] ss:$16 sps:$4 sm:$0xff]   ;;  %v560_v22 = vld [vmem:[#allocation2 + $0xa0] ss:$16 sps:$4 sm:$0xff]  }
  0x1a   :  { %v561_v23 = vld [vmem:[#allocation2 + $0xa8] ss:$16 sps:$4 sm:$0xff]   ;;  %v562_v24 = vld [vmem:[#allocation2 + $0xc4] ss:$16 sps:$4 sm:$0xff]   ;;  %v564_v25 = vld [vmem:[#allocation2 + $0xcc] ss:$16 sps:$4 sm:$0xff]  }
  0x1b   :  { %v566_v26 = vld [vmem:[#allocation2 + $0xc0] ss:$16 sps:$4 sm:$0xff]   ;;  %v567_v27 = vld [vmem:[#allocation2 + $0xc8] ss:$16 sps:$4 sm:$0xff]   ;;  %v568_v28 = vld [vmem:[#allocation2 + $0xe4] ss:$16 sps:$4 sm:$0xff]  }
  0x1c   :  { %377 = vmatpush1.bf16.msra.mxu0 %v542_v10  ;;  %418 = vmatpush1.bf16.msra.mxu1 %v543_v11  ;;  %v570_v29 = vld [vmem:[#allocation2 + $0xec] ss:$16 sps:$4 sm:$0xff]   ;;  %v572_v30 = vld [vmem:[#allocation2 + $0xe0] ss:$16 sps:$4 sm:$0xff]   ;;  %v573_v31 = vld [vmem:[#allocation2 + $0xe8] ss:$16 sps:$4 sm:$0xff]  }
  0x1d   :  { %378 = vmatprep.subr.bf16.mxu0 %v544_v12  ;;  %419 = vmatprep.subr.bf16.mxu1 %v546_v13  ;;  %v574_v32 = vld [vmem:[#allocation2 + $0x104] ss:$16 sps:$4 sm:$0xff]   ;;  %v576_v33 = vld [vmem:[#allocation2 + $0x10c] ss:$16 sps:$4 sm:$0xff]   ;;  %v578_v34 = vld [vmem:[#allocation2 + $0x100] ss:$16 sps:$4 sm:$0xff]  }
  0x1e   :  { %v579_v35 = vld [vmem:[#allocation2 + $0x108] ss:$16 sps:$4 sm:$0xff]   ;;  %v580_v37 = vld [vmem:[#allocation2 + $0x124] ss:$16 sps:$4 sm:$0xff]   ;;  %v582_v38 = vld [vmem:[#allocation2 + $0x12c] ss:$16 sps:$4 sm:$0xff]  }
  0x1f   :  { %v30_v36 = vld [vmem:[%s682_s0 + $0x8] sm:$0xff]  ;;  %vm355_vm0 = vcmask 588800   ;;  %v584_v40 = vld [vmem:[#allocation2 + $0x120] ss:$16 sps:$4 sm:$0xff]   ;;  %v586_v42 = vld [vmem:[#allocation2 + $0x144] ss:$16 sps:$4 sm:$0xff]  }
  0x20   :  { %379 = vmatpush1.bf16.msra.mxu0 %v548_v14  ;;  %420 = vmatpush1.bf16.msra.mxu1 %v549_v15  ;;  %v32_v39 = vpack.c.bf16 %v30_v36, %v30_v36  ;;  %v585_v41 = vld [vmem:[#allocation2 + $0x128] ss:$16 sps:$4 sm:$0xff]   ;;  %v588_v43 = vld [vmem:[#allocation2 + $0x14c] ss:$16 sps:$4 sm:$0xff]   ;;  %v590_v44 = vld [vmem:[#allocation2 + $0x140] ss:$16 sps:$4 sm:$0xff]  }
  0x21   :  { %380 = vmatprep.subr.bf16.mxu0 %v550_v16  ;;  %421 = vmatprep.subr.bf16.mxu1 %v552_v17  ;;  %v591_v45 = vld [vmem:[#allocation2 + $0x148] ss:$16 sps:$4 sm:$0xff]   ;;  %v592_v46 = vld [vmem:[#allocation2 + $0x164] ss:$16 sps:$4 sm:$0xff]   ;;  %v594_v47 = vld [vmem:[#allocation2 + $0x16c] ss:$16 sps:$4 sm:$0xff]  }
  0x22   :  { %520 = vmatprep.mubr.msk.bf16.mxu0 %vm355_vm0, %v32_v39  ;;  %522 = vmatprep.mubr.msk.bf16.mxu1 %vm355_vm0, %v32_v39  ;;  %v81_v48 = vld [vmem:[#allocation2 + $0x180] sm:$0xff]  ;;  %v82_v49 = vld [vmem:[#allocation2 + $0x188] sm:$0xff]  ;;  %vm359_vm1 = vcmask 1043456   ;;  %v86_v61 = vshrl.u32 %v85_v60, 7 }
  0x23   :  { %v596_v50 = vld [vmem:[#allocation2 + $0x160] ss:$16 sps:$4 sm:$0xff]   ;;  %v597_v51 = vld [vmem:[#allocation2 + $0x168] ss:$16 sps:$4 sm:$0xff]   ;;  %v516_v52 = vcombine.high %v81_v48, %v81_v48  ;;  %v518_v53 = vcombine.high %v82_v49, %v82_v49  ;;  %v515_v54 = vcombine.low %v81_v48, %v81_v48  ;;  %v517_v55 = vcombine.low %v82_v49, %v82_v49 }
  0x24   :  { %381 = vmatpush1.bf16.msra.mxu0 %v554_v18  ;;  %422 = vmatpush1.bf16.msra.mxu1 %v555_v19  ;;  %v29_v56 = vld [vmem:[%s682_s0] sm:$0xff]  ;;  %v87_v62 = vsub.s32 0, %v86_v61  ;;  %v95_v63 = vsub.s32 2, %v86_v61  ;;  %v91_v1 = vsub.s32 1, %v86_v61  ;;  %v99_v2 = vsub.s32 3, %v86_v61 }
  0x25   :  { %382 = vmatprep.subr.bf16.mxu0 %v556_v20  ;;  %423 = vmatprep.subr.bf16.mxu1 %v558_v21  ;;  %v361_v57 = vsel %vm359_vm1, %v515_v54, 0  ;;  %v367_v58 = vsel %vm359_vm1, %v517_v55, 0  ;;  %v31_v59 = vpack.c.bf16 %v29_v56, %v29_v56  ;;  %v83_v0 = vld [vmem:[%s684_s2] sm:$0xf] }
  0x26   :  { %v88_v3 = vrot.slane %v83_v0, %v87_v62  ;;  %v96_v4 = vrot.slane %v83_v0, %v95_v63  ;;  %v92_v5 = vrot.slane %v83_v0, %v91_v1  ;;  %v100_v6 = vrot.slane %v83_v0, %v99_v2 }
  0x28   :  { %383 = vmatpush1.bf16.msra.mxu0 %v560_v22  ;;  %424 = vmatpush1.bf16.msra.mxu1 %v561_v23 }
  0x29   :  { %384 = vmatprep.subr.bf16.mxu0 %v562_v24  ;;  %425 = vmatprep.subr.bf16.mxu1 %v564_v25 }
  0x2c   :  { %385 = vmatpush1.bf16.msra.mxu0 %v566_v26  ;;  %426 = vmatpush1.bf16.msra.mxu1 %v567_v27 }
  0x2d   :  { %386 = vmatprep.subr.bf16.mxu0 %v568_v28  ;;  %427 = vmatprep.subr.bf16.mxu1 %v570_v29 }
  0x30   :  { %387 = vmatpush1.bf16.msra.mxu0 %v572_v30  ;;  %428 = vmatpush1.bf16.msra.mxu1 %v573_v31 }
  0x31   :  { %388 = vmatprep.subr.bf16.mxu0 %v574_v32  ;;  %429 = vmatprep.subr.bf16.mxu1 %v576_v33 }
  0x34   :  { %389 = vmatpush1.bf16.msra.mxu0 %v578_v34  ;;  %430 = vmatpush1.bf16.msra.mxu1 %v579_v35 }
  0x35   :  { %390 = vmatprep.subr.bf16.mxu0 %v580_v37  ;;  %431 = vmatprep.subr.bf16.mxu1 %v582_v38 }
  0x38   :  { %391 = vmatpush1.bf16.msra.mxu0 %v584_v40  ;;  %432 = vmatpush1.bf16.msra.mxu1 %v585_v41 }
  0x39   :  { %392 = vmatprep.subr.bf16.mxu0 %v586_v42  ;;  %433 = vmatprep.subr.bf16.mxu1 %v588_v43 }
  0x3c   :  { %393 = vmatpush1.bf16.msra.mxu0 %v590_v44  ;;  %434 = vmatpush1.bf16.msra.mxu1 %v591_v45 }
  0x3d   :  { %394 = vmatprep.subr.bf16.mxu0 %v592_v46  ;;  %435 = vmatprep.subr.bf16.mxu1 %v594_v47 }
  0x40   :  { %395 = vmatpush1.bf16.msra.mxu0 %v596_v50  ;;  %436 = vmatpush1.bf16.msra.mxu1 %v597_v51 }
  0x41   :  { %519 = vmatprep.subr.msk.bf16.mxu0 %vm359_vm1, %v516_v52  ;;  %521 = vmatprep.subr.msk.bf16.mxu1 %vm359_vm1, %v518_v53 }
  0x44   :  { %397 = vmatpush1.bf16.msra.mxu0 %v361_v57  ;;  %438 = vmatpush1.bf16.msra.mxu1 %v367_v58 }
  0x47   :  { %405 = vmatmul.mubr.bf16.vlgmr.msra.gmra.mrb[0].mxu0 %v31_v59  ;;  %446 = vmatmul.mubr.bf16.vlgmr.msra.gmra.mrb[0].mxu1 %v31_v59 }
 0x11a   :  { %v406_v7 = vpop.f32.mrb[0].mxu0  ;;  %v447_v8 = vpop.f32.mrb[0].mxu1 }
 0x11b   :  { %v407_v9 = vadd.f32 %v406_v7, %v88_v3  ;;  %v448_v10 = vadd.f32 %v447_v8, %v96_v4  ;;  %v408_v11 = vpop.f32.mrb[1].mxu0  ;;  %v449_v12 = vpop.f32.mrb[1].mxu1 }
 0x11c   :  { %v409_v13 = vadd.f32 %v408_v11, %v92_v5  ;;  %v450_v14 = vadd.f32 %v449_v12, %v100_v6  ;;  %v410_v15 = vpop.f32.mrb[2].mxu0  ;;  %v451_v16 = vpop.f32.mrb[2].mxu1 }
 0x11d   :  { %v454_v17 = vmax.f32 %v407_v9, 0.0  ;;  %v456_v18 = vmax.f32 %v448_v10, 0.0  ;;  %v411_v19 = vpop.f32.mrb[3].mxu0  ;;  %v452_v20 = vpop.f32.mrb[3].mxu1 }
 0x11e   :  { %v455_v21 = vmax.f32 %v409_v13, 0.0  ;;  %v457_v22 = vmax.f32 %v450_v14, 0.0 }
 0x11f   :  { %458 = vst [vmem:[%s685_s3] sm:$0xff] %v454_v17  ;;  %460 = vst [vmem:[%s685_s3 + $0x10] sm:$0xff] %v456_v18 }
 0x120   :  { %459 = vst [vmem:[%s685_s3 + $0x8] sm:$0xff] %v455_v21  ;;  %461 = vst [vmem:[%s685_s3 + $0x18] sm:$0xff] %v457_v22 }
 0x121   :  { %466 = vsyncpa [#allocation3], 1 }

// kernel: vae_forward.10
= control target key start
LH: loop header
LB: loop body
LE: loop exit
PB: predicated region body
PF: predicated region fallthrough
CT: control target
= control target key end

     0   :  { %19 = vsyncpa [#allocation3], 0  ;;  %v918_v2 = vmov 0.0   ;;  %s1219_s0 = inlined_call_operand.vmem [shape: f32[8,256], index: 0, kind: input, shape index: {}]   ;;  %s1220_s1 = inlined_call_operand.vmem [shape: bf16[256,128], index: 1, kind: input, shape index: {}]   ;;  %s1221_s2 = inlined_call_operand.vmem [shape: f32[1,128], index: 2, kind: input, shape index: {}]   ;;  %s1222_s3 = inlined_call_operand.vmem [shape: bf16[128,128], index: 3, kind: input, shape index: {}]   ;;  %s1223_s4 = inlined_call_operand.vmem [shape: f32[1,128], index: 4, kind: input, shape index: {}]   ;;  %s1224_s5 = inlined_call_operand.vmem [shape: bf16[128,128], index: 5, kind: input, shape index: {}]   ;;  %s1225_s6 = inlined_call_operand.vmem [shape: f32[1,128], index: 6, kind: input, shape index: {}]   ;;  %s1226_s7 = inlined_call_operand.vmem [shape: bf16[128,256], index: 7, kind: input, shape index: {}]   ;;  %s1227_s8 = inlined_call_operand.vmem [shape: f32[1,256], index: 8, kind: input, shape index: {}]   ;;  %s1228_s9 = inlined_call_operand.vmem [shape: f32[8,128], index: 9, kind: input, shape index: {}]   ;;  %s1229_s10 = inlined_call_operand.hbm [shape: f32[8,128], index: 10, kind: output, shape index: {0}]   ;;  %s1230_s11 = inlined_call_operand.hbm [shape: f32[8,128], index: 11, kind: output, shape index: {1}]   ;;  %s1231_s12 = inlined_call_operand.hbm [shape: f32[8,128], index: 12, kind: output, shape index: {2}]   ;;  %s1232_s13 = inlined_call_operand.vmem [shape: f32[8,256], index: 13, kind: output, shape index: {3}]  }
   0x1   :  { %v790_v0 = vld [vmem:[%s1220_s1 + $0x40] sm:$0xff]   ;;  %744 = vmatprep.subr.bf16.mxu1 %v918_v2  ;;  %v792_v3 = vld [vmem:[%s1220_s1 + $0x48] sm:$0xff]   ;;  %v794_v5 = vld [vmem:[%s1220_s1 + $0x50] sm:$0xff]  }
   0x2   :  { %v791_v1 = vld [vmem:[%s1220_s1] sm:$0xff]   ;;  %704 = vmatprep.subr.bf16.mxu0 %v790_v0  ;;  %v793_v4 = vld [vmem:[%s1220_s1 + $0x8] sm:$0xff]   ;;  %v795_v6 = vld [vmem:[%s1220_s1 + $0x10] sm:$0xff]  }
   0x3   :  { %705 = vmatpush3.bf16.msra.mxu0 %v791_v1  ;;  %v796_v7 = vld [vmem:[%s1220_s1 + $0x58] sm:$0xff]   ;;  %v798_v9 = vld [vmem:[%s1220_s1 + $0x60] sm:$0xff]   ;;  %v800_v11 = vld [vmem:[%s1220_s1 + $0x68] sm:$0xff]  }
   0x4   :  { %706 = vmatprep.subr.bf16.mxu0 %v792_v3  ;;  %v797_v8 = vld [vmem:[%s1220_s1 + $0x18] sm:$0xff]   ;;  %v799_v10 = vld [vmem:[%s1220_s1 + $0x20] sm:$0xff]   ;;  %v43_v12 = vld [vmem:[%s1219_s0 + $0x8] sm:$0xff] }
   0x5   :  { %v45_v13 = vpack.c.bf16 %v43_v12, %v43_v12  ;;  %v806_v14 = vld [vmem:[%s1222_s3] sm:$0xff]   ;;  %v801_v15 = vld [vmem:[%s1220_s1 + $0x28] sm:$0xff]   ;;  %v802_v16 = vld [vmem:[%s1220_s1 + $0x70] sm:$0xff]  }
   0x6   :  { %745 = vmatpush3.bf16.msra.mxu1 %v806_v14  ;;  %v808_v17 = vld [vmem:[%s1222_s3 + $0x8] sm:$0xff]   ;;  %v803_v18 = vld [vmem:[%s1220_s1 + $0x30] sm:$0xff]   ;;  %v804_v19 = vld [vmem:[%s1220_s1 + $0x78] sm:$0xff]  }
   0x7   :  { %707 = vmatpush3.bf16.msra.mxu0 %v793_v4  ;;  %213 = vmatprep.mubr.bf16.mxu0 %v45_v13  ;;  %v810_v20 = vld [vmem:[%s1222_s3 + $0x10] sm:$0xff]   ;;  %v805_v21 = vld [vmem:[%s1220_s1 + $0x38] sm:$0xff]   ;;  %v42_v22 = vld [vmem:[%s1219_s0] sm:$0xff] }
   0x8   :  { %708 = vmatprep.subr.bf16.mxu0 %v794_v5  ;;  %746 = vmatprep.subr.bf16.mxu1 %v918_v2  ;;  %v812_v23 = vld [vmem:[%s1222_s3 + $0x18] sm:$0xff]   ;;  %v807_v24 = vld [vmem:[%s1224_s5] sm:$0xff]   ;;  %v44_v25 = vpack.c.bf16 %v42_v22, %v42_v22  ;;  %v809_v27 = vld [vmem:[%s1224_s5 + $0x8] sm:$0xff]  }
   0x9   :  { %v814_v26 = vld [vmem:[%s1222_s3 + $0x20] sm:$0xff]   ;;  %v816_v28 = vld [vmem:[%s1222_s3 + $0x28] sm:$0xff]  }
   0xa   :  { %747 = vmatpush3.bf16.msra.mxu1 %v808_v17 }
   0xb   :  { %709 = vmatpush3.bf16.msra.mxu0 %v795_v6  ;;  %748 = vmatprep.subr.bf16.mxu1 %v918_v2 }
   0xc   :  { %710 = vmatprep.subr.bf16.mxu0 %v796_v7 }
   0xe   :  { %749 = vmatpush3.bf16.msra.mxu1 %v810_v20 }
   0xf   :  { %711 = vmatpush3.bf16.msra.mxu0 %v797_v8  ;;  %750 = vmatprep.subr.bf16.mxu1 %v918_v2 }
  0x10   :  { %712 = vmatprep.subr.bf16.mxu0 %v798_v9 }
  0x12   :  { %751 = vmatpush3.bf16.msra.mxu1 %v812_v23 }
  0x13   :  { %713 = vmatpush3.bf16.msra.mxu0 %v799_v10  ;;  %752 = vmatprep.subr.bf16.mxu1 %v918_v2 }
  0x14   :  { %714 = vmatprep.subr.bf16.mxu0 %v800_v11 }
  0x16   :  { %753 = vmatpush3.bf16.msra.mxu1 %v814_v26 }
  0x17   :  { %715 = vmatpush3.bf16.msra.mxu0 %v801_v15 }
  0x18   :  { %716 = vmatprep.subr.bf16.mxu0 %v802_v16 }
  0x1b   :  { %717 = vmatpush3.bf16.msra.mxu0 %v803_v18 }
  0x1c   :  { %718 = vmatprep.subr.bf16.mxu0 %v804_v19 }
  0x1f   :  { %719 = vmatpush3.bf16.msra.mxu0 %v805_v21 }
  0x20   :  { %764 = vmatprep.subr.bf16.mxu0 %v918_v2 }
  0x22   :  { %214 = vmatmul.mubr.bf16.vlgmr.msra.gmra.mrb[0].mxu0 %v44_v25 }
  0x23   :  { %765 = vmatpush3.bf16.msra.mxu0 %v807_v24 }
  0x24   :  { %766 = vmatprep.subr.bf16.mxu0 %v918_v2 }
  0x25   :  { %20 = vsyncpa [#allocation5], 0  ;;  %754 = vmatprep.subr.bf16.mxu1 %v918_v2  ;;  %v811_v29 = vld [vmem:[%s1224_s5 + $0x10] sm:$0xff]   ;;  %v813_v30 = vld [vmem:[%s1224_s5 + $0x18] sm:$0xff]   ;;  %vm919_vm0 = vmmov 0   ;;  %v920_v59 = vmov 0  }
  0x26   :  { %755 = vmatpush3.bf16.msra.mxu1 %v816_v28  ;;  %v815_v31 = vld [vmem:[%s1224_s5 + $0x20] sm:$0xff]   ;;  %v817_v32 = vld [vmem:[%s1224_s5 + $0x28] sm:$0xff]   ;;  %v818_v33 = vld [vmem:[%s1222_s3 + $0x30] sm:$0xff]   ;;  %760 = vmatprep.mubr.msk.bf16.mxu1 %vm919_vm0, %v918_v2  ;;  %s922_s18 = smov [#allocation2]  }
  0x27   :  { %767 = vmatpush3.bf16.msra.mxu0 %v809_v27  ;;  %756 = vmatprep.subr.bf16.mxu1 %v918_v2  ;;  %v819_v34 = vld [vmem:[%s1224_s5 + $0x30] sm:$0xff]   ;;  %v820_v35 = vld [vmem:[%s1222_s3 + $0x38] sm:$0xff]   ;;  %v824_v37 = vld [vmem:[%s1226_s7 + $0x4] ss:$8 sps:$4 sm:$0xff]   ;;  %s614_s19 = sshll.u32 %s922_s18, 4  ;;  %s615_s19 = int_to_ptr.vmem [resolvable:$true] %s614_s19 }
  0x28   :  { %768 = vmatprep.subr.bf16.mxu0 %v918_v2  ;;  %v821_v36 = vld [vmem:[%s1224_s5 + $0x38] sm:$0xff]   ;;  %780 = vmatprep.mubr.msk.bf16.mxu0 %vm919_vm0, %v918_v2  ;;  %v653_v39 = vld [vmem:[%s1221_s2] ss:$0 sm:$0xff]  ;;  %v830_v50 = vld [vmem:[%s1226_s7 + $0x24] ss:$8 sps:$4 sm:$0xff]  }
  0x29   :  { %v822_v46 = vld [vmem:[%s1226_s7] ss:$8 sps:$4 sm:$0xff]   ;;  %v827_v48 = vld [vmem:[%s1226_s7 + $0x14] ss:$8 sps:$4 sm:$0xff]   ;;  %v825_v49 = vld [vmem:[%s1226_s7 + $0x10] ss:$8 sps:$4 sm:$0xff]  }
  0x2a   :  { %757 = vmatpush3.bf16.msra.mxu1 %v818_v33  ;;  %v828_v51 = vld [vmem:[%s1226_s7 + $0x20] ss:$8 sps:$4 sm:$0xff]   ;;  %v833_v52 = vld [vmem:[%s1226_s7 + $0x34] ss:$8 sps:$4 sm:$0xff]   ;;  %v831_v53 = vld [vmem:[%s1226_s7 + $0x30] ss:$8 sps:$4 sm:$0xff]  }
  0x2b   :  { %769 = vmatpush3.bf16.msra.mxu0 %v811_v29  ;;  %758 = vmatprep.subr.bf16.mxu1 %v918_v2  ;;  %v836_v54 = vld [vmem:[%s1226_s7 + $0x44] ss:$8 sps:$4 sm:$0xff]   ;;  %v834_v55 = vld [vmem:[%s1226_s7 + $0x40] ss:$8 sps:$4 sm:$0xff]   ;;  %v839_v56 = vld [vmem:[%s1226_s7 + $0x54] ss:$8 sps:$4 sm:$0xff]  }
  0x2c   :  { %770 = vmatprep.subr.bf16.mxu0 %v918_v2  ;;  %v837_v57 = vld [vmem:[%s1226_s7 + $0x50] ss:$8 sps:$4 sm:$0xff]   ;;  %v842_v58 = vld [vmem:[%s1226_s7 + $0x64] ss:$8 sps:$4 sm:$0xff]   ;;  %v840_v60 = vld [vmem:[%s1226_s7 + $0x60] ss:$8 sps:$4 sm:$0xff]  }
  0x2d   :  { %v845_v61 = vld [vmem:[%s1226_s7 + $0x74] ss:$8 sps:$4 sm:$0xff]   ;;  %v843_v62 = vld [vmem:[%s1226_s7 + $0x70] ss:$8 sps:$4 sm:$0xff]   ;;  %v670_v63 = vld [vmem:[%s1223_s4] ss:$0 sm:$0xff] }
  0x2e   :  { %759 = vmatpush3.bf16.msra.mxu1 %v820_v35  ;;  %v679_v0 = vld [vmem:[%s1225_s6] ss:$0 sm:$0xff]  ;;  %s921_s6 = smov [#allocation4]  }
  0x2f   :  { %771 = vmatpush3.bf16.msra.mxu0 %v813_v30  ;;  %563 = vmatprep.subr.bf16.mxu1 %v824_v37  ;;  %v448_v13 = vld [vmem:[%s1228_s9] sm:$0xff]  ;;  %s624_s17 = sshll.u32 %s921_s6, 4  ;;  %s625_s17 = int_to_ptr.vmem [resolvable:$true] %s624_s17 }
  0x30   :  { %772 = vmatprep.subr.bf16.mxu0 %v918_v2  ;;  %s848_s20 = scalar_lea.vmem %s625_s17, 128  ;;  %p853_p1 = scmp.lt.s32.totalorder %s625_s17, %s625_s17 }
  0x31   :  { %p849_p0 = scmp.ne.s32.totalorder %s625_s17, %s848_s20  ;;  %p854_p2 = scmp.lt.s32.totalorder %s848_s20, %s848_s20 }
  0x33   :  { %773 = vmatpush3.bf16.msra.mxu0 %v815_v31  ;;  %p855_p3 = por %p854_p2, %p853_p1 }
  0x34   :  { %774 = vmatprep.subr.bf16.mxu0 %v918_v2 }
  0x35   :  { %p856_p4 = pnand %p855_p3, %p849_p0 }
  0x37   :  { %775 = vmatpush3.bf16.msra.mxu0 %v817_v32 }
  0x38   :  { %776 = vmatprep.subr.bf16.mxu0 %v918_v2 }
  0x3b   :  { %777 = vmatpush3.bf16.msra.mxu0 %v819_v34 }
  0x3c   :  { %778 = vmatprep.subr.bf16.mxu0 %v918_v2 }
  0x3f   :  { %779 = vmatpush3.bf16.msra.mxu0 %v821_v36 }
  0xf5   :  { %v720_v38 = vpop.f32.mrb[0].mxu0 }
  0xf6   :  { %v721_v40 = vpop.f32.mrb[1].mxu0 }
  0xf7   :  { %v722_v41 = vadd.f32 %v721_v40, %v720_v38  ;;  %v723_v42 = vpop.f32.mrb[2].mxu0 }
  0xf8   :  { %v724_v43 = vpop.f32.mrb[3].mxu0 }
  0xf9   :  { %v216_v44 = vadd.f32 %v722_v41, %v653_v39 }
  0xfb   :  { %v221_v45 = vmax.f32 %v216_v44, 0.0 }
  0xfd   :  { %222 = vst [vmem:[#allocation2] sm:$0xff] %v221_v45  ;;  %v223_v47 = vpack.c.bf16 %v221_v45, %v221_v45 }
  0xff   :  { %761 = vmatmul.mubr.bf16.vlgmr.msra.gmra.mrb[0].mxu1 %v223_v47  ;;  %781 = vmatmul.mubr.bf16.vlgmr.msra.gmra.mrb[4].mxu0 %v223_v47 }
 0x100   :  { %564 = vmatpush1.bf16.msra.mxu1 %v822_v46  ;;  %595 = vmatprep.mubr.bf16.mxu1 %v920_v59 }
 0x101   :  { %565 = vmatprep.subr.bf16.mxu1 %v827_v48 }
 0x104   :  { %566 = vmatpush1.bf16.msra.mxu1 %v825_v49 }
 0x105   :  { %567 = vmatprep.subr.bf16.mxu1 %v830_v50 }
 0x108   :  { %568 = vmatpush1.bf16.msra.mxu1 %v828_v51 }
 0x109   :  { %569 = vmatprep.subr.bf16.mxu1 %v833_v52 }
 0x10c   :  { %570 = vmatpush1.bf16.msra.mxu1 %v831_v53 }
 0x10d   :  { %571 = vmatprep.subr.bf16.mxu1 %v836_v54 }
 0x110   :  { %572 = vmatpush1.bf16.msra.mxu1 %v834_v55 }
 0x111   :  { %573 = vmatprep.subr.bf16.mxu1 %v839_v56 }
 0x114   :  { %574 = vmatpush1.bf16.msra.mxu1 %v837_v57 }
 0x115   :  { %575 = vmatprep.subr.bf16.mxu1 %v842_v58 }
 0x118   :  { %576 = vmatpush1.bf16.msra.mxu1 %v840_v60 }
 0x119   :  { %577 = vmatprep.subr.bf16.mxu1 %v845_v61 }
 0x11c   :  { %578 = vmatpush1.bf16.msra.mxu1 %v843_v62 }
 0x1d2   :  { %v329_v1 = vpop.f32.mrb[0].mxu1  ;;  %v440_v2 = vpop.f32.mrb[4].mxu0 }
 0x1d3   :  { %v330_v3 = vadd.f32 %v670_v63, %v329_v1  ;;  %v441_v4 = vadd.f32 %v679_v0, %v440_v2  ;;  %v762_v5 = vpop.f32.mrb[1].mxu1  ;;  %v782_v6 = vpop.f32.mrb[5].mxu0 }
 0x1d4   :  { %v332_v7 = vpop.f32.mrb[2].mxu1  ;;  %v443_v8 = vpop.f32.mrb[6].mxu0 }
 0x1d5   :  { %446 = vst [vmem:[#allocation4] sm:$0xff] %v330_v3  ;;  %v449_v9 = vmul.f32 0.5, %v441_v4  ;;  %447 = vst [vmem:[#allocation6] sm:$0xff] %v441_v4  ;;  %v763_v10 = vpop.f32.mrb[3].mxu1  ;;  %v783_v11 = vpop.f32.mrb[7].mxu0 }
 0x1d7   :  { %v450_v12 = vmul.f32 1.442695, %v449_v9 }
 0x1d9   :  { %846 = vpow2.f32 %v450_v12 }
 0x1e3   :  { %v847_v14 = vpop.eup %846 }
 0x1e4   :  { %v452_v15 = vmul.f32 %v847_v14, %v448_v13 }
 0x1e6   :  { %v453_v16 = vadd.f32 %v452_v15, %v330_v3 }
 0x1e8   :  { %v454_v17 = vpack.c.bf16 %v453_v16, %v453_v16 }
 0x1ea   :  { %596 = vmatmul.mubr.bf16.vlgmr.msra.gmra.mrb[4].mxu1 %v454_v17 }
 0x1eb   :  { %859 = shalt.err (!%p856_p4)
}
 0x1ec   :  { %s860_s9 = scalar_lea.hbm %s1230_s11, 128 }
 0x1ed   :  { %p861_p5 = scmp.ne.s32.totalorder %s1230_s11, %s860_s9  ;;  %p864_p6 = scmp.lt.u32.totalorder %s860_s9, %s1230_s11 }
 0x1ef   :  { %p866_p7 = pnand %p864_p6, %p861_p5 }
 0x1f1   :  { %869 = shalt.err (!%p866_p7)
}
 0x1f2   :  { %627 = dma.vmem_to_hbm [thread:$0]  %s625_s17, 128, %s1230_s11, [#allocation5]  }
 0x1f3   :  { %s870_s25 = scalar_lea.vmem %s615_s19, 128  ;;  %p875_p9 = scmp.lt.s32.totalorder %s615_s19, %s615_s19 }
 0x1f4   :  { %p871_p8 = scmp.ne.s32.totalorder %s615_s19, %s870_s25  ;;  %p876_p10 = scmp.lt.s32.totalorder %s870_s25, %s870_s25 }
 0x1f6   :  { %p877_p11 = por %p876_p10, %p875_p9 }
 0x1f8   :  { %p878_p12 = pnand %p877_p11, %p871_p8 }
 0x1fa   :  { %881 = shalt.err (!%p878_p12)
}
 0x1fb   :  { %s882_s27 = scalar_lea.hbm %s1229_s10, 128 }
 0x1fc   :  { %p883_p13 = scmp.ne.s32.totalorder %s1229_s10, %s882_s27  ;;  %p886_p0 = scmp.lt.u32.totalorder %s882_s27, %s1229_s10 }
 0x1fe   :  { %p888_p1 = pnand %p886_p0, %p883_p13 }
 0x200   :  { %891 = shalt.err (!%p888_p1)
}
 0x201   :  { %617 = dma.vmem_to_hbm [thread:$0]  %s615_s19, 128, %s1229_s10, [#allocation3]  }
 0x202   :  { %s923_s16 = smov [#allocation6]  }
 0x203   :  { %s634_s4 = sshll.u32 %s923_s16, 4  ;;  %s635_s4 = int_to_ptr.vmem [resolvable:$true] %s634_s4 }
 0x204   :  { %s892_s7 = scalar_lea.vmem %s635_s4, 128  ;;  %p897_p3 = scmp.lt.s32.totalorder %s635_s4, %s635_s4 }
 0x205   :  { %p893_p2 = scmp.ne.s32.totalorder %s635_s4, %s892_s7  ;;  %p898_p4 = scmp.lt.s32.totalorder %s892_s7, %s892_s7 }
 0x207   :  { %p899_p5 = por %p898_p4, %p897_p3 }
 0x209   :  { %p900_p6 = pnand %p899_p5, %p893_p2 }
 0x20b   :  { %903 = shalt.err (!%p900_p6)
}
 0x20c   :  { %s904_s18 = scalar_lea.hbm %s1231_s12, 128 }
 0x20d   :  { %p905_p7 = scmp.ne.s32.totalorder %s1231_s12, %s904_s18  ;;  %p908_p8 = scmp.lt.u32.totalorder %s904_s18, %s1231_s12 }
 0x20f   :  { %p910_p9 = pnand %p908_p8, %p905_p7 }
 0x211   :  { %913 = shalt.err (!%p910_p9)
}
 0x212   :  { %637 = dma.vmem_to_hbm [thread:$0]  %s635_s4, 128, %s1231_s12, [#allocation5]   ;;  %v473_v18 = vlaneseq  ;;  %v471_v21 = vld [vmem:[%s1227_s8] sm:$0x3] }
 0x214   :  { %v474_v19 = vshrl.u32 %v473_v18, 7 }
 0x216   :  { %v475_v20 = vsub.s32 0, %v474_v19  ;;  %v479_v22 = vsub.s32 1, %v474_v19 }
 0x218   :  { %v476_v23 = vrot.slane %v471_v21, %v475_v20  ;;  %v480_v24 = vrot.slane %v471_v21, %v479_v22 }
 0x2bd   :  { %v597_v25 = vpop.f32.mrb[4].mxu1 }
 0x2be   :  { %v598_v26 = vadd.f32 %v597_v25, %v476_v23  ;;  %v599_v27 = vpop.f32.mrb[5].mxu1 }
 0x2bf   :  { %v600_v28 = vadd.f32 %v599_v27, %v480_v24  ;;  %v601_v29 = vpop.f32.mrb[6].mxu1 }
 0x2c0   :  { %v604_v30 = vmax.f32 %v598_v26, 0.0  ;;  %v602_v31 = vpop.f32.mrb[7].mxu1 }
 0x2c1   :  { %v605_v32 = vmax.f32 %v600_v28, 0.0 }
 0x2c2   :  { %606 = vst [vmem:[%s1232_s13] sm:$0xff] %v604_v30 }
 0x2c3   :  { %607 = vst [vmem:[%s1232_s13 + $0x8] sm:$0xff] %v605_v32 }
 0x2c4   :  { %914 = dma.done.wait [#allocation3], 128  }
 0x2c5   :  { %915 = vsyncadd [#allocation3], 4294967168 }
 0x2c6   :  { %916 = dma.done.wait [#allocation5], 256  }
 0x2c7   :  { %917 = vsyncadd [#allocation5], 4294967040 }
 0x2c8   :  { %651 = vsyncpa [#allocation3], 1 }
 0x2c9   :  { %652 = vsyncpa [#allocation5], 1 }

// kernel: vae_forward.8
= control target key start
LH: loop header
LB: loop body
LE: loop exit
PB: predicated region body
PF: predicated region fallthrough
CT: control target
= control target key end

     0   :  { %8 = vsyncpa [#allocation3], 0  ;;  %s1168_s12 = smov [#allocation2]   ;;  %s1227_s0 = inlined_call_operand.vmem [shape: f32[8,512], index: 0, kind: input, shape index: {}]   ;;  %s1228_s1 = inlined_call_operand.hbm [shape: bf16[512,384], index: 1, kind: input, shape index: {}]   ;;  %s1229_s2 = inlined_call_operand.vmem [shape: f32[1,384], index: 2, kind: input, shape index: {}]   ;;  %s1230_s3 = inlined_call_operand.vmem [shape: f32[8,384], index: 3, kind: output, shape index: {}]  }
   0x1   :  { %s16_s13 = sshll.u32 %s1168_s12, 4  ;;  %s1144_s16 = scalar_lea.hbm %s1228_s1, 12288  ;;  %s17_s13 = int_to_ptr.vmem [resolvable:$true] %s16_s13 }
   0x2   :  { %p1145_p0 = scmp.ne.s32.totalorder %s1228_s1, %s1144_s16  ;;  %p1148_p1 = scmp.lt.u32.totalorder %s1144_s16, %s1228_s1 }
   0x4   :  { %p1150_p2 = pnand %p1148_p1, %p1145_p0 }
   0x6   :  { %1153 = shalt.err (!%p1150_p2)
}
   0x7   :  { %s1154_s21 = scalar_lea.vmem %s17_s13, 12288  ;;  %p1159_p4 = scmp.lt.s32.totalorder %s17_s13, %s17_s13 }
   0x8   :  { %p1155_p3 = scmp.ne.s32.totalorder %s17_s13, %s1154_s21  ;;  %p1160_p5 = scmp.lt.s32.totalorder %s1154_s21, %s1154_s21 }
   0xa   :  { %p1161_p6 = por %p1160_p5, %p1159_p4 }
   0xc   :  { %p1162_p7 = pnand %p1161_p6, %p1155_p3 }
   0xe   :  { %1165 = shalt.err (!%p1162_p7)
}
   0xf   :  { %s1169_s22 = smov 192   ;;  %s1170_s23 = smov 12  }
  0x10   :  { %22 = dma.hbm_to_vmem [thread:$0]  %s1228_s1, 12288, %s17_s13, [#allocation3], %s1169_s22, %s1169_s22, %s1170_s23  }
  0x11   :  { %1166 = dma.done.wait [#allocation3], 12288  }
  0x12   :  { %1167 = vsyncadd [#allocation3], 4294955008  ;;  %v1016_v0 = vld [vmem:[#allocation2 + $0x4] ss:$12 sps:$4 sm:$0xff]   ;;  %v1018_v1 = vld [vmem:[#allocation2] ss:$12 sps:$4 sm:$0xff]  }
  0x13   :  { %694 = vmatprep.subr.bf16.mxu0 %v1016_v0  ;;  %v1019_v2 = vld [vmem:[#allocation2 + $0x1c] ss:$12 sps:$4 sm:$0xff]   ;;  %v1021_v3 = vld [vmem:[#allocation2 + $0x18] ss:$12 sps:$4 sm:$0xff]   ;;  %v1022_v4 = vld [vmem:[#allocation2 + $0x34] ss:$12 sps:$4 sm:$0xff]  }
  0x14   :  { %695 = vmatpush1.bf16.msra.mxu0 %v1018_v1  ;;  %v1024_v5 = vld [vmem:[#allocation2 + $0x30] ss:$12 sps:$4 sm:$0xff]   ;;  %v1025_v6 = vld [vmem:[#allocation2 + $0x4c] ss:$12 sps:$4 sm:$0xff]   ;;  %v1027_v7 = vld [vmem:[#allocation2 + $0x48] ss:$12 sps:$4 sm:$0xff]  }
  0x15   :  { %696 = vmatprep.subr.bf16.mxu0 %v1019_v2  ;;  %v1028_v8 = vld [vmem:[#allocation2 + $0x64] ss:$12 sps:$4 sm:$0xff]   ;;  %v1042_v9 = vld [vmem:[#allocation2 + $0xc8] ss:$12 sps:$4 sm:$0xff]   ;;  %v1030_v11 = vld [vmem:[#allocation2 + $0x60] ss:$12 sps:$4 sm:$0xff]  }
  0x16   :  { %v1044_v10 = vld [vmem:[#allocation2 + $0x8] ss:$12 sps:$4 sm:$0xff]   ;;  %963 = vmatprep.subr.bf16.mxu1 %v1042_v9  ;;  %v1047_v12 = vld [vmem:[#allocation2 + $0xe0] ss:$12 sps:$4 sm:$0xff]   ;;  %v1033_v15 = vld [vmem:[#allocation2 + $0x78] ss:$12 sps:$4 sm:$0xff]  }
  0x17   :  { %964 = vmatpush3.bf16.msra.mxu1 %v1044_v10  ;;  %v1031_v13 = vld [vmem:[#allocation2 + $0x7c] ss:$12 sps:$4 sm:$0xff]   ;;  %v1049_v14 = vld [vmem:[#allocation2 + $0x20] ss:$12 sps:$4 sm:$0xff]   ;;  %v1052_v17 = vld [vmem:[#allocation2 + $0xf8] ss:$12 sps:$4 sm:$0xff]  }
  0x18   :  { %697 = vmatpush1.bf16.msra.mxu0 %v1021_v3  ;;  %965 = vmatprep.subr.bf16.mxu1 %v1047_v12  ;;  %v1034_v16 = vld [vmem:[#allocation2 + $0x94] ss:$12 sps:$4 sm:$0xff]   ;;  %v1054_v18 = vld [vmem:[#allocation2 + $0x38] ss:$12 sps:$4 sm:$0xff]   ;;  %v1036_v19 = vld [vmem:[#allocation2 + $0x90] ss:$12 sps:$4 sm:$0xff]  }
  0x19   :  { %698 = vmatprep.subr.bf16.mxu0 %v1022_v4  ;;  %v1057_v20 = vld [vmem:[#allocation2 + $0x110] ss:$12 sps:$4 sm:$0xff]   ;;  %v1037_v22 = vld [vmem:[#allocation2 + $0xac] ss:$12 sps:$4 sm:$0xff]   ;;  %v1062_v23 = vld [vmem:[#allocation2 + $0x128] ss:$12 sps:$4 sm:$0xff]  }
  0x1a   :  { %v1059_v21 = vld [vmem:[#allocation2 + $0x50] ss:$12 sps:$4 sm:$0xff]   ;;  %v1039_v24 = vld [vmem:[#allocation2 + $0xa8] ss:$12 sps:$4 sm:$0xff]   ;;  %v1067_v27 = vld [vmem:[#allocation2 + $0x140] ss:$12 sps:$4 sm:$0xff]  }
  0x1b   :  { %966 = vmatpush3.bf16.msra.mxu1 %v1049_v14  ;;  %v1064_v25 = vld [vmem:[#allocation2 + $0x68] ss:$12 sps:$4 sm:$0xff]   ;;  %v1040_v26 = vld [vmem:[#allocation2 + $0xc4] ss:$12 sps:$4 sm:$0xff]   ;;  %v1043_v28 = vld [vmem:[#allocation2 + $0xc0] ss:$12 sps:$4 sm:$0xff]  }
  0x1c   :  { %699 = vmatpush1.bf16.msra.mxu0 %v1024_v5  ;;  %967 = vmatprep.subr.bf16.mxu1 %v1052_v17  ;;  %v1069_v29 = vld [vmem:[#allocation2 + $0x80] ss:$12 sps:$4 sm:$0xff]   ;;  %v1045_v30 = vld [vmem:[#allocation2 + $0xdc] ss:$12 sps:$4 sm:$0xff]   ;;  %v1072_v31 = vld [vmem:[#allocation2 + $0x158] ss:$12 sps:$4 sm:$0xff]  }
  0x1d   :  { %700 = vmatprep.subr.bf16.mxu0 %v1025_v6  ;;  %v1048_v32 = vld [vmem:[#allocation2 + $0xd8] ss:$12 sps:$4 sm:$0xff]   ;;  %v1050_v33 = vld [vmem:[#allocation2 + $0xf4] ss:$12 sps:$4 sm:$0xff]   ;;  %v1077_v35 = vld [vmem:[#allocation2 + $0x170] ss:$12 sps:$4 sm:$0xff]  }
  0x1e   :  { %v1074_v34 = vld [vmem:[#allocation2 + $0x98] ss:$12 sps:$4 sm:$0xff]   ;;  %v1053_v36 = vld [vmem:[#allocation2 + $0xf0] ss:$12 sps:$4 sm:$0xff]   ;;  %v30_v37 = vld [vmem:[%s1227_s0 + $0x8] sm:$0xff] }
  0x1f   :  { %968 = vmatpush3.bf16.msra.mxu1 %v1054_v18  ;;  %v1055_v38 = vld [vmem:[#allocation2 + $0x10c] ss:$12 sps:$4 sm:$0xff]   ;;  %v1079_v39 = vld [vmem:[#allocation2 + $0xb0] ss:$12 sps:$4 sm:$0xff]   ;;  %v34_v40 = vpack.c.bf16 %v30_v37, %v30_v37  ;;  %v1083_v41 = vld [vmem:[#allocation2 + $0x248] ss:$12 sps:$4 sm:$0xff]  }
  0x20   :  { %701 = vmatpush1.bf16.msra.mxu0 %v1027_v7  ;;  %969 = vmatprep.subr.bf16.mxu1 %v1057_v20  ;;  %v29_v42 = vld [vmem:[%s1227_s0] sm:$0xff]  ;;  %v1058_v43 = vld [vmem:[#allocation2 + $0x108] ss:$12 sps:$4 sm:$0xff]   ;;  %v1098_v55 = vld [vmem:[#allocation2 + $0x290] ss:$12 sps:$4 sm:$0xff]  }
  0x21   :  { %702 = vmatprep.subr.bf16.mxu0 %v1028_v8  ;;  %726 = vmatprep.mubr.bf16.mxu0 %v34_v40  ;;  %v1060_v44 = vld [vmem:[#allocation2 + $0x124] ss:$12 sps:$4 sm:$0xff]   ;;  %v33_v45 = vpack.c.bf16 %v29_v42, %v29_v42  ;;  %v1084_v46 = vld [vmem:[#allocation2 + $0x188] ss:$12 sps:$4 sm:$0xff]   ;;  %v1088_v47 = vld [vmem:[#allocation2 + $0x260] ss:$12 sps:$4 sm:$0xff]  }
  0x22   :  { %808 = vmatprep.mubr.bf16.mxu1 %v34_v40  ;;  %v1063_v48 = vld [vmem:[#allocation2 + $0x120] ss:$12 sps:$4 sm:$0xff]   ;;  %v1065_v49 = vld [vmem:[#allocation2 + $0x13c] ss:$12 sps:$4 sm:$0xff]   ;;  %v1093_v51 = vld [vmem:[#allocation2 + $0x278] ss:$12 sps:$4 sm:$0xff]  }
  0x23   :  { %970 = vmatpush3.bf16.msra.mxu1 %v1059_v21  ;;  %v1089_v50 = vld [vmem:[#allocation2 + $0x1a0] ss:$12 sps:$4 sm:$0xff]   ;;  %v1068_v52 = vld [vmem:[#allocation2 + $0x138] ss:$12 sps:$4 sm:$0xff]   ;;  %v1073_v56 = vld [vmem:[#allocation2 + $0x150] ss:$12 sps:$4 sm:$0xff]  }
  0x24   :  { %703 = vmatpush1.bf16.msra.mxu0 %v1030_v11  ;;  %971 = vmatprep.subr.bf16.mxu1 %v1062_v23  ;;  %v1094_v53 = vld [vmem:[#allocation2 + $0x1b8] ss:$12 sps:$4 sm:$0xff]   ;;  %v1070_v54 = vld [vmem:[#allocation2 + $0x154] ss:$12 sps:$4 sm:$0xff]   ;;  %v1099_v58 = vld [vmem:[#allocation2 + $0x1d0] ss:$12 sps:$4 sm:$0xff]  }
  0x25   :  { %704 = vmatprep.subr.bf16.mxu0 %v1031_v13  ;;  %v1075_v57 = vld [vmem:[#allocation2 + $0x16c] ss:$12 sps:$4 sm:$0xff]   ;;  %v1103_v59 = vld [vmem:[#allocation2 + $0x2a8] ss:$12 sps:$4 sm:$0xff]   ;;  %v1082_v61 = vld [vmem:[#allocation2 + $0x184] ss:$12 sps:$4 sm:$0xff]  }
  0x26   :  { %v1078_v60 = vld [vmem:[#allocation2 + $0x168] ss:$12 sps:$4 sm:$0xff]   ;;  %v1108_v63 = vld [vmem:[#allocation2 + $0x2c0] ss:$12 sps:$4 sm:$0xff]   ;;  %v1113_v3 = vld [vmem:[#allocation2 + $0x2d8] ss:$12 sps:$4 sm:$0xff]  }
  0x27   :  { %972 = vmatpush3.bf16.msra.mxu1 %v1064_v25  ;;  %v1104_v62 = vld [vmem:[#allocation2 + $0x1e8] ss:$12 sps:$4 sm:$0xff]   ;;  %v1080_v0 = vld [vmem:[#allocation2 + $0x180] ss:$12 sps:$4 sm:$0xff]   ;;  %v32_v4 = vld [vmem:[%s1227_s0 + $0x18] sm:$0xff] }
  0x28   :  { %705 = vmatpush1.bf16.msra.mxu0 %v1033_v15  ;;  %973 = vmatprep.subr.bf16.mxu1 %v1067_v27  ;;  %v1087_v1 = vld [vmem:[#allocation2 + $0x19c] ss:$12 sps:$4 sm:$0xff]   ;;  %v1109_v2 = vld [vmem:[#allocation2 + $0x200] ss:$12 sps:$4 sm:$0xff]   ;;  %v36_v5 = vpack.c.bf16 %v32_v4, %v32_v4  ;;  %v1085_v6 = vld [vmem:[#allocation2 + $0x198] ss:$12 sps:$4 sm:$0xff]  }
  0x29   :  { %706 = vmatprep.subr.bf16.mxu0 %v1034_v16  ;;  %v1092_v7 = vld [vmem:[#allocation2 + $0x1b4] ss:$12 sps:$4 sm:$0xff]   ;;  %v1114_v8 = vld [vmem:[#allocation2 + $0x218] ss:$12 sps:$4 sm:$0xff]   ;;  %v1118_v9 = vld [vmem:[#allocation2 + $0x2f0] ss:$12 sps:$4 sm:$0xff]  }
  0x2a   :  { %v1090_v10 = vld [vmem:[#allocation2 + $0x1b0] ss:$12 sps:$4 sm:$0xff]   ;;  %v1097_v13 = vld [vmem:[#allocation2 + $0x1cc] ss:$12 sps:$4 sm:$0xff]   ;;  %v1095_v15 = vld [vmem:[#allocation2 + $0x1c8] ss:$12 sps:$4 sm:$0xff]  }
  0x2b   :  { %974 = vmatpush3.bf16.msra.mxu1 %v1069_v29  ;;  %v1119_v11 = vld [vmem:[#allocation2 + $0x230] ss:$12 sps:$4 sm:$0xff]   ;;  %v1100_v17 = vld [vmem:[#allocation2 + $0x1e0] ss:$12 sps:$4 sm:$0xff]   ;;  %v1115_v23 = vld [vmem:[#allocation2 + $0x228] ss:$12 sps:$4 sm:$0xff]  }
  0x2c   :  { %707 = vmatpush1.bf16.msra.mxu0 %v1036_v19  ;;  %975 = vmatprep.subr.bf16.mxu1 %v1072_v31  ;;  %v31_v12 = vld [vmem:[%s1227_s0 + $0x10] sm:$0xff]  ;;  %v1107_v18 = vld [vmem:[#allocation2 + $0x1fc] ss:$12 sps:$4 sm:$0xff]   ;;  %v1105_v19 = vld [vmem:[#allocation2 + $0x1f8] ss:$12 sps:$4 sm:$0xff]  }
  0x2d   :  { %708 = vmatprep.subr.bf16.mxu0 %v1037_v22  ;;  %v35_v14 = vpack.c.bf16 %v31_v12, %v31_v12  ;;  %v1102_v16 = vld [vmem:[#allocation2 + $0x1e4] ss:$12 sps:$4 sm:$0xff]   ;;  %v1112_v20 = vld [vmem:[#allocation2 + $0x214] ss:$12 sps:$4 sm:$0xff]   ;;  %v1117_v22 = vld [vmem:[#allocation2 + $0x22c] ss:$12 sps:$4 sm:$0xff]  }
  0x2e   :  { %v1110_v21 = vld [vmem:[#allocation2 + $0x210] ss:$12 sps:$4 sm:$0xff]   ;;  %v1120_v25 = vld [vmem:[#allocation2 + $0x240] ss:$12 sps:$4 sm:$0xff]   ;;  %v1123_v27 = vld [vmem:[#allocation2 + $0x258] ss:$12 sps:$4 sm:$0xff]  }
  0x2f   :  { %976 = vmatpush3.bf16.msra.mxu1 %v1074_v34  ;;  %v1126_v29 = vld [vmem:[#allocation2 + $0x270] ss:$12 sps:$4 sm:$0xff]   ;;  %v1129_v31 = vld [vmem:[#allocation2 + $0x288] ss:$12 sps:$4 sm:$0xff]  }
  0x30   :  { %709 = vmatpush1.bf16.msra.mxu0 %v1039_v24  ;;  %977 = vmatprep.subr.bf16.mxu1 %v1077_v35  ;;  %v1122_v24 = vld [vmem:[#allocation2 + $0x244] ss:$12 sps:$4 sm:$0xff]   ;;  %v1137_v34 = vld [vmem:[#allocation2 + $0x2bc] ss:$12 sps:$4 sm:$0xff]  }
  0x31   :  { %710 = vmatprep.subr.bf16.mxu0 %v1040_v26  ;;  %v1125_v26 = vld [vmem:[#allocation2 + $0x25c] ss:$12 sps:$4 sm:$0xff]   ;;  %v1135_v35 = vld [vmem:[#allocation2 + $0x2b8] ss:$12 sps:$4 sm:$0xff]  }
  0x32   :  { %v1138_v37 = vld [vmem:[#allocation2 + $0x2d0] ss:$12 sps:$4 sm:$0xff]  }
  0x33   :  { %978 = vmatpush3.bf16.msra.mxu1 %v1079_v39  ;;  %v1141_v39 = vld [vmem:[#allocation2 + $0x2e8] ss:$12 sps:$4 sm:$0xff]  }
  0x34   :  { %711 = vmatpush1.bf16.msra.mxu0 %v1043_v28  ;;  %985 = vmatprep.subr.bf16.mxu1 %v1083_v41  ;;  %v1128_v28 = vld [vmem:[#allocation2 + $0x274] ss:$12 sps:$4 sm:$0xff]  }
  0x35   :  { %712 = vmatprep.subr.bf16.mxu0 %v1045_v30  ;;  %v1131_v30 = vld [vmem:[#allocation2 + $0x28c] ss:$12 sps:$4 sm:$0xff]  }
  0x36   :  { %809 = vmatmul.mubr.bf16.vlgmr.msra.gmra.mrb[0].mxu1 %v33_v45 }
  0x37   :  { %986 = vmatpush3.bf16.msra.mxu1 %v1084_v46  ;;  %848 = vmatprep.mubr.bf16.mxu1 %v36_v5 }
  0x38   :  { %713 = vmatpush1.bf16.msra.mxu0 %v1048_v32  ;;  %987 = vmatprep.subr.bf16.mxu1 %v1088_v47  ;;  %v1134_v32 = vld [vmem:[#allocation2 + $0x2a4] ss:$12 sps:$4 sm:$0xff]  }
  0x39   :  { %714 = vmatprep.subr.bf16.mxu0 %v1050_v33  ;;  %v1132_v33 = vld [vmem:[#allocation2 + $0x2a0] ss:$12 sps:$4 sm:$0xff]  }
  0x3b   :  { %988 = vmatpush3.bf16.msra.mxu1 %v1089_v50 }
  0x3c   :  { %715 = vmatpush1.bf16.msra.mxu0 %v1053_v36  ;;  %989 = vmatprep.subr.bf16.mxu1 %v1093_v51  ;;  %v1140_v36 = vld [vmem:[#allocation2 + $0x2d4] ss:$12 sps:$4 sm:$0xff]  }
  0x3d   :  { %716 = vmatprep.subr.bf16.mxu0 %v1055_v38  ;;  %v1143_v38 = vld [vmem:[#allocation2 + $0x2ec] ss:$12 sps:$4 sm:$0xff]  }
  0x3f   :  { %990 = vmatpush3.bf16.msra.mxu1 %v1094_v53 }
  0x40   :  { %717 = vmatpush1.bf16.msra.mxu0 %v1058_v43  ;;  %991 = vmatprep.subr.bf16.mxu1 %v1098_v55 }
  0x41   :  { %718 = vmatprep.subr.bf16.mxu0 %v1060_v44 }
  0x43   :  { %992 = vmatpush3.bf16.msra.mxu1 %v1099_v58 }
  0x44   :  { %719 = vmatpush1.bf16.msra.mxu0 %v1063_v48  ;;  %993 = vmatprep.subr.bf16.mxu1 %v1103_v59  ;;  %v165_v48 = vld [vmem:[%s1229_s2] sm:$0x7] }
  0x45   :  { %720 = vmatprep.subr.bf16.mxu0 %v1065_v49 }
  0x47   :  { %994 = vmatpush3.bf16.msra.mxu1 %v1104_v62 }
  0x48   :  { %721 = vmatpush1.bf16.msra.mxu0 %v1068_v52  ;;  %995 = vmatprep.subr.bf16.mxu1 %v1108_v63 }
  0x49   :  { %722 = vmatprep.subr.bf16.mxu0 %v1070_v54 }
  0x4b   :  { %996 = vmatpush3.bf16.msra.mxu1 %v1109_v2 }
  0x4c   :  { %723 = vmatpush1.bf16.msra.mxu0 %v1073_v56  ;;  %997 = vmatprep.subr.bf16.mxu1 %v1113_v3 }
  0x4d   :  { %724 = vmatprep.subr.bf16.mxu0 %v1075_v57 }
  0x4f   :  { %998 = vmatpush3.bf16.msra.mxu1 %v1114_v8 }
  0x50   :  { %725 = vmatpush1.bf16.msra.mxu0 %v1078_v60  ;;  %999 = vmatprep.subr.bf16.mxu1 %v1118_v9 }
  0x51   :  { %735 = vmatprep.subr.bf16.mxu0 %v1082_v61 }
  0x53   :  { %727 = vmatmul.mubr.bf16.vlgmr.msra.gmra.mrb[0].mxu0 %v33_v45  ;;  %1000 = vmatpush3.bf16.msra.mxu1 %v1119_v11  ;;  %v167_v45 = vlaneseq }
  0x54   :  { %736 = vmatpush1.bf16.msra.mxu0 %v1080_v0  ;;  %767 = vmatprep.mubr.bf16.mxu0 %v36_v5 }
  0x55   :  { %737 = vmatprep.subr.bf16.mxu0 %v1087_v1  ;;  %v168_v46 = vshrl.u32 %v167_v45, 7 }
  0x56   :  { %849 = vmatmul.mubr.bf16.vlgmr.msra.gmra.mrb[4].mxu1 %v35_v14 }
  0x57   :  { %v177_v47 = vsub.s32 2, %v168_v46  ;;  %v169_v58 = vsub.s32 0, %v168_v46  ;;  %v173_v59 = vsub.s32 1, %v168_v46 }
  0x58   :  { %738 = vmatpush1.bf16.msra.mxu0 %v1085_v6 }
  0x59   :  { %739 = vmatprep.subr.bf16.mxu0 %v1092_v7  ;;  %v178_v49 = vrot.slane %v165_v48, %v177_v47  ;;  %v170_v60 = vrot.slane %v165_v48, %v169_v58  ;;  %v174_v61 = vrot.slane %v165_v48, %v173_v59 }
  0x5c   :  { %740 = vmatpush1.bf16.msra.mxu0 %v1090_v10 }
  0x5d   :  { %741 = vmatprep.subr.bf16.mxu0 %v1097_v13 }
  0x60   :  { %742 = vmatpush1.bf16.msra.mxu0 %v1095_v15 }
  0x61   :  { %743 = vmatprep.subr.bf16.mxu0 %v1102_v16 }
  0x64   :  { %744 = vmatpush1.bf16.msra.mxu0 %v1100_v17 }
  0x65   :  { %745 = vmatprep.subr.bf16.mxu0 %v1107_v18 }
  0x68   :  { %746 = vmatpush1.bf16.msra.mxu0 %v1105_v19 }
  0x69   :  { %747 = vmatprep.subr.bf16.mxu0 %v1112_v20 }
  0x6c   :  { %748 = vmatpush1.bf16.msra.mxu0 %v1110_v21 }
  0x6d   :  { %749 = vmatprep.subr.bf16.mxu0 %v1117_v22 }
  0x70   :  { %750 = vmatpush1.bf16.msra.mxu0 %v1115_v23 }
  0x71   :  { %751 = vmatprep.subr.bf16.mxu0 %v1122_v24 }
  0x74   :  { %752 = vmatpush1.bf16.msra.mxu0 %v1120_v25 }
  0x75   :  { %753 = vmatprep.subr.bf16.mxu0 %v1125_v26 }
  0x78   :  { %754 = vmatpush1.bf16.msra.mxu0 %v1123_v27 }
  0x79   :  { %755 = vmatprep.subr.bf16.mxu0 %v1128_v28 }
  0x7c   :  { %756 = vmatpush1.bf16.msra.mxu0 %v1126_v29 }
  0x7d   :  { %757 = vmatprep.subr.bf16.mxu0 %v1131_v30 }
  0x80   :  { %758 = vmatpush1.bf16.msra.mxu0 %v1129_v31 }
  0x81   :  { %759 = vmatprep.subr.bf16.mxu0 %v1134_v32 }
  0x84   :  { %760 = vmatpush1.bf16.msra.mxu0 %v1132_v33 }
  0x85   :  { %761 = vmatprep.subr.bf16.mxu0 %v1137_v34 }
  0x88   :  { %762 = vmatpush1.bf16.msra.mxu0 %v1135_v35 }
  0x89   :  { %763 = vmatprep.subr.bf16.mxu0 %v1140_v36 }
  0x8c   :  { %764 = vmatpush1.bf16.msra.mxu0 %v1138_v37 }
  0x8d   :  { %765 = vmatprep.subr.bf16.mxu0 %v1143_v38 }
  0x90   :  { %766 = vmatpush1.bf16.msra.mxu0 %v1141_v39 }
  0x93   :  { %768 = vmatmul.mubr.bf16.vlgmr.msra.gmra.mrb[0].mxu0 %v35_v14 }
 0x109   :  { %v979_v40 = vpop.f32.mrb[0].mxu1 }
 0x10a   :  { %v980_v41 = vpop.f32.mrb[1].mxu1 }
 0x10b   :  { %v981_v42 = vadd.f32 %v980_v41, %v979_v40  ;;  %v982_v43 = vpop.f32.mrb[2].mxu1 }
 0x10c   :  { %v983_v44 = vpop.f32.mrb[3].mxu1 }
 0x10d   :  { %v811_v50 = vadd.f32 %v981_v42, %v178_v49 }
 0x129   :  { %v1001_v51 = vpop.f32.mrb[4].mxu1 }
 0x12a   :  { %v1002_v52 = vpop.f32.mrb[5].mxu1 }
 0x12b   :  { %v1003_v53 = vadd.f32 %v1002_v52, %v1001_v51  ;;  %v1004_v54 = vpop.f32.mrb[6].mxu1 }
 0x12c   :  { %v1005_v55 = vpop.f32.mrb[7].mxu1 }
 0x12d   :  { %v851_v56 = vadd.f32 %v1003_v53, %v811_v50 }
 0x12f   :  { %v858_v57 = vmax.f32 %v851_v56, 0.0 }
 0x131   :  { %861 = vst [vmem:[%s1230_s3 + $0x10] sm:$0xff] %v858_v57 }
 0x166   :  { %v769_v62 = vpop.f32.mrb[0].mxu0 }
 0x167   :  { %v1007_v63 = vadd.f32 %v769_v62, %v170_v60  ;;  %v771_v0 = vpop.f32.mrb[1].mxu0 }
 0x168   :  { %v1008_v1 = vadd.f32 %v771_v0, %v174_v61  ;;  %v773_v2 = vpop.f32.mrb[2].mxu0 }
 0x169   :  { %v856_v3 = vmax.f32 %v1007_v63, 0.0  ;;  %v774_v4 = vpop.f32.mrb[3].mxu0 }
 0x16a   :  { %v857_v5 = vmax.f32 %v1008_v1, 0.0 }
 0x16b   :  { %859 = vst [vmem:[%s1230_s3] sm:$0xff] %v856_v3 }
 0x16c   :  { %860 = vst [vmem:[%s1230_s3 + $0x8] sm:$0xff] %v857_v5 }
 0x16d   :  { %866 = vsyncpa [#allocation3], 1 }

// kernel: vae_forward.11
= control target key start
LH: loop header
LB: loop body
LE: loop exit
PB: predicated region body
PF: predicated region fallthrough
CT: control target
= control target key end

     0   :  { %v85_v52 = vlaneseq  ;;  %s763_s1 = inlined_call_operand.vmem [shape: bf16[256,384], index: 1, kind: input, shape index: {}]   ;;  %s764_s0 = inlined_call_operand.vmem [shape: f32[8,256], index: 0, kind: input, shape index: {}]   ;;  %s765_s2 = inlined_call_operand.vmem [shape: f32[1,384], index: 2, kind: input, shape index: {}]   ;;  %s766_s3 = inlined_call_operand.vmem [shape: f32[8,384], index: 3, kind: output, shape index: {}]  }
   0x1   :  { %v517_v0 = vld [vmem:[%s763_s1 + $0x4] ss:$12 sps:$4 sm:$0xff]   ;;  %v519_v1 = vld [vmem:[%s763_s1] ss:$12 sps:$4 sm:$0xff]   ;;  %v520_v2 = vld [vmem:[%s763_s1 + $0x1c] ss:$12 sps:$4 sm:$0xff]  }
   0x2   :  { %356 = vmatprep.subr.bf16.mxu0 %v517_v0  ;;  %v522_v3 = vld [vmem:[%s763_s1 + $0x18] ss:$12 sps:$4 sm:$0xff]   ;;  %v523_v4 = vld [vmem:[%s763_s1 + $0x34] ss:$12 sps:$4 sm:$0xff]   ;;  %v525_v5 = vld [vmem:[%s763_s1 + $0x30] ss:$12 sps:$4 sm:$0xff]  }
   0x3   :  { %357 = vmatpush1.bf16.msra.mxu0 %v519_v1  ;;  %v526_v6 = vld [vmem:[%s763_s1 + $0x4c] ss:$12 sps:$4 sm:$0xff]   ;;  %v538_v7 = vld [vmem:[%s763_s1 + $0xc8] ss:$12 sps:$4 sm:$0xff]   ;;  %v529_v9 = vld [vmem:[%s763_s1 + $0x64] ss:$12 sps:$4 sm:$0xff]  }
   0x4   :  { %358 = vmatprep.subr.bf16.mxu0 %v520_v2  ;;  %v528_v8 = vld [vmem:[%s763_s1 + $0x48] ss:$12 sps:$4 sm:$0xff]   ;;  %495 = vmatprep.subr.bf16.mxu1 %v538_v7  ;;  %v543_v11 = vld [vmem:[%s763_s1 + $0xe0] ss:$12 sps:$4 sm:$0xff]   ;;  %v548_v15 = vld [vmem:[%s763_s1 + $0xf8] ss:$12 sps:$4 sm:$0xff]  }
   0x5   :  { %v541_v10 = vld [vmem:[%s763_s1 + $0x8] ss:$12 sps:$4 sm:$0xff]   ;;  %v531_v12 = vld [vmem:[%s763_s1 + $0x60] ss:$12 sps:$4 sm:$0xff]   ;;  %v534_v16 = vld [vmem:[%s763_s1 + $0x78] ss:$12 sps:$4 sm:$0xff]  }
   0x6   :  { %496 = vmatpush3.bf16.msra.mxu1 %v541_v10  ;;  %v532_v13 = vld [vmem:[%s763_s1 + $0x7c] ss:$12 sps:$4 sm:$0xff]   ;;  %v546_v14 = vld [vmem:[%s763_s1 + $0x20] ss:$12 sps:$4 sm:$0xff]   ;;  %v551_v17 = vld [vmem:[%s763_s1 + $0x38] ss:$12 sps:$4 sm:$0xff]  }
   0x7   :  { %359 = vmatpush1.bf16.msra.mxu0 %v522_v3  ;;  %497 = vmatprep.subr.bf16.mxu1 %v543_v11  ;;  %v535_v18 = vld [vmem:[%s763_s1 + $0x94] ss:$12 sps:$4 sm:$0xff]   ;;  %v553_v19 = vld [vmem:[%s763_s1 + $0x110] ss:$12 sps:$4 sm:$0xff]   ;;  %v539_v23 = vld [vmem:[%s763_s1 + $0xac] ss:$12 sps:$4 sm:$0xff]  }
   0x8   :  { %360 = vmatprep.subr.bf16.mxu0 %v523_v4  ;;  %v537_v20 = vld [vmem:[%s763_s1 + $0x90] ss:$12 sps:$4 sm:$0xff]   ;;  %v558_v22 = vld [vmem:[%s763_s1 + $0x128] ss:$12 sps:$4 sm:$0xff]   ;;  %v563_v26 = vld [vmem:[%s763_s1 + $0x140] ss:$12 sps:$4 sm:$0xff]  }
   0x9   :  { %v556_v21 = vld [vmem:[%s763_s1 + $0x50] ss:$12 sps:$4 sm:$0xff]   ;;  %v542_v24 = vld [vmem:[%s763_s1 + $0xa8] ss:$12 sps:$4 sm:$0xff]   ;;  %v547_v28 = vld [vmem:[%s763_s1 + $0xc0] ss:$12 sps:$4 sm:$0xff]  }
   0xa   :  { %498 = vmatpush3.bf16.msra.mxu1 %v546_v14  ;;  %v561_v25 = vld [vmem:[%s763_s1 + $0x68] ss:$12 sps:$4 sm:$0xff]   ;;  %v544_v27 = vld [vmem:[%s763_s1 + $0xc4] ss:$12 sps:$4 sm:$0xff]   ;;  %v566_v29 = vld [vmem:[%s763_s1 + $0x80] ss:$12 sps:$4 sm:$0xff]  }
   0xb   :  { %361 = vmatpush1.bf16.msra.mxu0 %v525_v5  ;;  %499 = vmatprep.subr.bf16.mxu1 %v548_v15  ;;  %v568_v30 = vld [vmem:[%s763_s1 + $0x158] ss:$12 sps:$4 sm:$0xff]   ;;  %v549_v31 = vld [vmem:[%s763_s1 + $0xdc] ss:$12 sps:$4 sm:$0xff]   ;;  %v554_v35 = vld [vmem:[%s763_s1 + $0xf4] ss:$12 sps:$4 sm:$0xff]  }
   0xc   :  { %362 = vmatprep.subr.bf16.mxu0 %v526_v6  ;;  %v571_v32 = vld [vmem:[%s763_s1 + $0x98] ss:$12 sps:$4 sm:$0xff]   ;;  %v573_v34 = vld [vmem:[%s763_s1 + $0x170] ss:$12 sps:$4 sm:$0xff]   ;;  %v16_v36 = vld [vmem:[%s764_s0 + $0x8] sm:$0xff]  ;;  %v86_v53 = vshrl.u32 %v85_v52, 7 }
   0xd   :  { %v552_v33 = vld [vmem:[%s763_s1 + $0xd8] ss:$12 sps:$4 sm:$0xff]   ;;  %v18_v37 = vpack.c.bf16 %v16_v36, %v16_v36  ;;  %v576_v38 = vld [vmem:[%s763_s1 + $0xb0] ss:$12 sps:$4 sm:$0xff]   ;;  %v562_v43 = vld [vmem:[%s763_s1 + $0x108] ss:$12 sps:$4 sm:$0xff]  }
   0xe   :  { %500 = vmatpush3.bf16.msra.mxu1 %v551_v17  ;;  %v15_v39 = vld [vmem:[%s764_s0] sm:$0xff]  ;;  %v557_v40 = vld [vmem:[%s763_s1 + $0xf0] ss:$12 sps:$4 sm:$0xff]   ;;  %v559_v41 = vld [vmem:[%s763_s1 + $0x10c] ss:$12 sps:$4 sm:$0xff]   ;;  %v95_v54 = vsub.s32 2, %v86_v53 }
   0xf   :  { %363 = vmatpush1.bf16.msra.mxu0 %v528_v8  ;;  %501 = vmatprep.subr.bf16.mxu1 %v553_v19  ;;  %v17_v42 = vpack.c.bf16 %v15_v39, %v15_v39  ;;  %v564_v44 = vld [vmem:[%s763_s1 + $0x124] ss:$12 sps:$4 sm:$0xff]   ;;  %v567_v45 = vld [vmem:[%s763_s1 + $0x120] ss:$12 sps:$4 sm:$0xff]   ;;  %v569_v46 = vld [vmem:[%s763_s1 + $0x13c] ss:$12 sps:$4 sm:$0xff]  }
  0x10   :  { %364 = vmatprep.subr.bf16.mxu0 %v529_v9  ;;  %429 = vmatprep.mubr.bf16.mxu1 %v18_v37  ;;  %v572_v47 = vld [vmem:[%s763_s1 + $0x138] ss:$12 sps:$4 sm:$0xff]   ;;  %v574_v48 = vld [vmem:[%s763_s1 + $0x154] ss:$12 sps:$4 sm:$0xff]   ;;  %v577_v49 = vld [vmem:[%s763_s1 + $0x150] ss:$12 sps:$4 sm:$0xff]  }
  0x11   :  { %388 = vmatprep.mubr.bf16.mxu0 %v18_v37  ;;  %v578_v50 = vld [vmem:[%s763_s1 + $0x16c] ss:$12 sps:$4 sm:$0xff]   ;;  %v580_v51 = vld [vmem:[%s763_s1 + $0x168] ss:$12 sps:$4 sm:$0xff]   ;;  %v83_v55 = vld [vmem:[%s765_s2] sm:$0x7] }
  0x12   :  { %502 = vmatpush3.bf16.msra.mxu1 %v556_v21  ;;  %v96_v57 = vrot.slane %v83_v55, %v95_v54  ;;  %v87_v0 = vsub.s32 0, %v86_v53  ;;  %v91_v1 = vsub.s32 1, %v86_v53 }
  0x13   :  { %365 = vmatpush1.bf16.msra.mxu0 %v531_v12  ;;  %503 = vmatprep.subr.bf16.mxu1 %v558_v22 }
  0x14   :  { %366 = vmatprep.subr.bf16.mxu0 %v532_v13  ;;  %v88_v2 = vrot.slane %v83_v55, %v87_v0  ;;  %v92_v3 = vrot.slane %v83_v55, %v91_v1 }
  0x16   :  { %504 = vmatpush3.bf16.msra.mxu1 %v561_v25 }
  0x17   :  { %367 = vmatpush1.bf16.msra.mxu0 %v534_v16  ;;  %505 = vmatprep.subr.bf16.mxu1 %v563_v26 }
  0x18   :  { %368 = vmatprep.subr.bf16.mxu0 %v535_v18 }
  0x1a   :  { %506 = vmatpush3.bf16.msra.mxu1 %v566_v29 }
  0x1b   :  { %369 = vmatpush1.bf16.msra.mxu0 %v537_v20  ;;  %507 = vmatprep.subr.bf16.mxu1 %v568_v30 }
  0x1c   :  { %370 = vmatprep.subr.bf16.mxu0 %v539_v23 }
  0x1e   :  { %508 = vmatpush3.bf16.msra.mxu1 %v571_v32 }
  0x1f   :  { %371 = vmatpush1.bf16.msra.mxu0 %v542_v24  ;;  %509 = vmatprep.subr.bf16.mxu1 %v573_v34 }
  0x20   :  { %372 = vmatprep.subr.bf16.mxu0 %v544_v27 }
  0x22   :  { %510 = vmatpush3.bf16.msra.mxu1 %v576_v38 }
  0x23   :  { %373 = vmatpush1.bf16.msra.mxu0 %v547_v28 }
  0x24   :  { %374 = vmatprep.subr.bf16.mxu0 %v549_v31 }
  0x25   :  { %430 = vmatmul.mubr.bf16.vlgmr.msra.gmra.mrb[0].mxu1 %v17_v42 }
  0x27   :  { %375 = vmatpush1.bf16.msra.mxu0 %v552_v33 }
  0x28   :  { %376 = vmatprep.subr.bf16.mxu0 %v554_v35 }
  0x2b   :  { %377 = vmatpush1.bf16.msra.mxu0 %v557_v40 }
  0x2c   :  { %378 = vmatprep.subr.bf16.mxu0 %v559_v41 }
  0x2f   :  { %379 = vmatpush1.bf16.msra.mxu0 %v562_v43 }
  0x30   :  { %380 = vmatprep.subr.bf16.mxu0 %v564_v44 }
  0x33   :  { %381 = vmatpush1.bf16.msra.mxu0 %v567_v45 }
  0x34   :  { %382 = vmatprep.subr.bf16.mxu0 %v569_v46 }
  0x37   :  { %383 = vmatpush1.bf16.msra.mxu0 %v572_v47 }
  0x38   :  { %384 = vmatprep.subr.bf16.mxu0 %v574_v48 }
  0x3b   :  { %385 = vmatpush1.bf16.msra.mxu0 %v577_v49 }
  0x3c   :  { %386 = vmatprep.subr.bf16.mxu0 %v578_v50 }
  0x3f   :  { %387 = vmatpush1.bf16.msra.mxu0 %v580_v51 }
  0x42   :  { %389 = vmatmul.mubr.bf16.vlgmr.msra.gmra.mrb[0].mxu0 %v17_v42 }
  0xf8   :  { %v511_v56 = vpop.f32.mrb[0].mxu1 }
  0xf9   :  { %v512_v58 = vpop.f32.mrb[1].mxu1 }
  0xfa   :  { %v513_v59 = vadd.f32 %v512_v58, %v511_v56  ;;  %v514_v60 = vpop.f32.mrb[2].mxu1 }
  0xfb   :  { %v515_v61 = vpop.f32.mrb[3].mxu1 }
  0xfc   :  { %v432_v62 = vadd.f32 %v513_v59, %v96_v57 }
  0xfe   :  { %v439_v63 = vmax.f32 %v432_v62, 0.0 }
 0x100   :  { %442 = vst [vmem:[%s766_s3 + $0x10] sm:$0xff] %v439_v63 }
 0x115   :  { %v390_v4 = vpop.f32.mrb[0].mxu0 }
 0x116   :  { %v391_v5 = vadd.f32 %v390_v4, %v88_v2  ;;  %v392_v6 = vpop.f32.mrb[1].mxu0 }
 0x117   :  { %v393_v7 = vadd.f32 %v392_v6, %v92_v3  ;;  %v394_v8 = vpop.f32.mrb[2].mxu0 }
 0x118   :  { %v437_v9 = vmax.f32 %v391_v5, 0.0  ;;  %v395_v10 = vpop.f32.mrb[3].mxu0 }
 0x119   :  { %v438_v11 = vmax.f32 %v393_v7, 0.0 }
 0x11a   :  { %440 = vst [vmem:[%s766_s3] sm:$0xff] %v437_v9 }
 0x11b   :  { %441 = vst [vmem:[%s766_s3 + $0x8] sm:$0xff] %v438_v11 }

// kernel: vae_forward.13
= control target key start
LH: loop header
LB: loop body
LE: loop exit
PB: predicated region body
PF: predicated region fallthrough
CT: control target
= control target key end

     0   :  { %s946_s0 = inlined_call_operand.vmem [shape: f32[8,512], index: 0, kind: input, shape index: {}]   ;;  %s947_s1 = inlined_call_operand.vmem [shape: bf16[512,256], index: 1, kind: input, shape index: {}]   ;;  %s948_s2 = inlined_call_operand.vmem [shape: f32[1,256], index: 2, kind: input, shape index: {}]   ;;  %s949_s3 = inlined_call_operand.hbm [shape: f32[8,256], index: 3, kind: output, shape index: {}]  }
   0x1   :  { %v586_v0 = vld [vmem:[%s947_s1 + $0x4] ss:$8 sps:$4 sm:$0xff]   ;;  %v590_v2 = vld [vmem:[%s947_s1] ss:$8 sps:$4 sm:$0xff]   ;;  %v592_v4 = vld [vmem:[%s947_s1 + $0x14] ss:$8 sps:$4 sm:$0xff]  }
   0x2   :  { %v588_v1 = vld [vmem:[%s947_s1 + $0x104] ss:$8 sps:$4 sm:$0xff]   ;;  %419 = vmatprep.subr.bf16.mxu1 %v586_v0  ;;  %v591_v3 = vld [vmem:[%s947_s1 + $0x100] ss:$8 sps:$4 sm:$0xff]   ;;  %v594_v5 = vld [vmem:[%s947_s1 + $0x114] ss:$8 sps:$4 sm:$0xff]  }
   0x3   :  { %460 = vmatprep.subr.bf16.mxu0 %v588_v1  ;;  %420 = vmatpush1.bf16.msra.mxu1 %v590_v2  ;;  %v596_v6 = vld [vmem:[%s947_s1 + $0x10] ss:$8 sps:$4 sm:$0xff]   ;;  %v598_v8 = vld [vmem:[%s947_s1 + $0x24] ss:$8 sps:$4 sm:$0xff]   ;;  %v602_v10 = vld [vmem:[%s947_s1 + $0x20] ss:$8 sps:$4 sm:$0xff]  }
   0x4   :  { %461 = vmatpush1.bf16.msra.mxu0 %v591_v3  ;;  %421 = vmatprep.subr.bf16.mxu1 %v592_v4  ;;  %v597_v7 = vld [vmem:[%s947_s1 + $0x110] ss:$8 sps:$4 sm:$0xff]   ;;  %v600_v9 = vld [vmem:[%s947_s1 + $0x124] ss:$8 sps:$4 sm:$0xff]   ;;  %v603_v11 = vld [vmem:[%s947_s1 + $0x120] ss:$8 sps:$4 sm:$0xff]  }
   0x5   :  { %462 = vmatprep.subr.bf16.mxu0 %v594_v5  ;;  %v604_v12 = vld [vmem:[%s947_s1 + $0x34] ss:$8 sps:$4 sm:$0xff]   ;;  %v608_v14 = vld [vmem:[%s947_s1 + $0x30] ss:$8 sps:$4 sm:$0xff]   ;;  %v610_v16 = vld [vmem:[%s947_s1 + $0x44] ss:$8 sps:$4 sm:$0xff]  }
   0x6   :  { %v606_v13 = vld [vmem:[%s947_s1 + $0x134] ss:$8 sps:$4 sm:$0xff]   ;;  %v609_v15 = vld [vmem:[%s947_s1 + $0x130] ss:$8 sps:$4 sm:$0xff]   ;;  %v612_v17 = vld [vmem:[%s947_s1 + $0x144] ss:$8 sps:$4 sm:$0xff]  }
   0x7   :  { %422 = vmatpush1.bf16.msra.mxu1 %v596_v6  ;;  %v614_v18 = vld [vmem:[%s947_s1 + $0x40] ss:$8 sps:$4 sm:$0xff]   ;;  %v616_v20 = vld [vmem:[%s947_s1 + $0x54] ss:$8 sps:$4 sm:$0xff]   ;;  %v620_v22 = vld [vmem:[%s947_s1 + $0x50] ss:$8 sps:$4 sm:$0xff]  }
   0x8   :  { %463 = vmatpush1.bf16.msra.mxu0 %v597_v7  ;;  %423 = vmatprep.subr.bf16.mxu1 %v598_v8  ;;  %v615_v19 = vld [vmem:[%s947_s1 + $0x140] ss:$8 sps:$4 sm:$0xff]   ;;  %v618_v21 = vld [vmem:[%s947_s1 + $0x154] ss:$8 sps:$4 sm:$0xff]   ;;  %v621_v23 = vld [vmem:[%s947_s1 + $0x150] ss:$8 sps:$4 sm:$0xff]  }
   0x9   :  { %464 = vmatprep.subr.bf16.mxu0 %v600_v9  ;;  %v622_v24 = vld [vmem:[%s947_s1 + $0x64] ss:$8 sps:$4 sm:$0xff]   ;;  %v626_v26 = vld [vmem:[%s947_s1 + $0x60] ss:$8 sps:$4 sm:$0xff]   ;;  %v628_v28 = vld [vmem:[%s947_s1 + $0x74] ss:$8 sps:$4 sm:$0xff]  }
   0xa   :  { %v624_v25 = vld [vmem:[%s947_s1 + $0x164] ss:$8 sps:$4 sm:$0xff]   ;;  %v627_v27 = vld [vmem:[%s947_s1 + $0x160] ss:$8 sps:$4 sm:$0xff]   ;;  %v630_v29 = vld [vmem:[%s947_s1 + $0x174] ss:$8 sps:$4 sm:$0xff]  }
   0xb   :  { %424 = vmatpush1.bf16.msra.mxu1 %v602_v10  ;;  %v632_v30 = vld [vmem:[%s947_s1 + $0x70] ss:$8 sps:$4 sm:$0xff]   ;;  %v634_v32 = vld [vmem:[%s947_s1 + $0x84] ss:$8 sps:$4 sm:$0xff]   ;;  %v638_v34 = vld [vmem:[%s947_s1 + $0x80] ss:$8 sps:$4 sm:$0xff]  }
   0xc   :  { %465 = vmatpush1.bf16.msra.mxu0 %v603_v11  ;;  %425 = vmatprep.subr.bf16.mxu1 %v604_v12  ;;  %v633_v31 = vld [vmem:[%s947_s1 + $0x170] ss:$8 sps:$4 sm:$0xff]   ;;  %v636_v33 = vld [vmem:[%s947_s1 + $0x184] ss:$8 sps:$4 sm:$0xff]   ;;  %v639_v35 = vld [vmem:[%s947_s1 + $0x180] ss:$8 sps:$4 sm:$0xff]  }
   0xd   :  { %466 = vmatprep.subr.bf16.mxu0 %v606_v13  ;;  %v640_v36 = vld [vmem:[%s947_s1 + $0x94] ss:$8 sps:$4 sm:$0xff]   ;;  %v644_v38 = vld [vmem:[%s947_s1 + $0x90] ss:$8 sps:$4 sm:$0xff]   ;;  %v646_v40 = vld [vmem:[%s947_s1 + $0xa4] ss:$8 sps:$4 sm:$0xff]  }
   0xe   :  { %v642_v37 = vld [vmem:[%s947_s1 + $0x194] ss:$8 sps:$4 sm:$0xff]   ;;  %v645_v39 = vld [vmem:[%s947_s1 + $0x190] ss:$8 sps:$4 sm:$0xff]   ;;  %v648_v41 = vld [vmem:[%s947_s1 + $0x1a4] ss:$8 sps:$4 sm:$0xff]  }
   0xf   :  { %426 = vmatpush1.bf16.msra.mxu1 %v608_v14  ;;  %v650_v42 = vld [vmem:[%s947_s1 + $0xa0] ss:$8 sps:$4 sm:$0xff]   ;;  %v652_v44 = vld [vmem:[%s947_s1 + $0xb4] ss:$8 sps:$4 sm:$0xff]   ;;  %v656_v49 = vld [vmem:[%s947_s1 + $0xb0] ss:$8 sps:$4 sm:$0xff]  }
  0x10   :  { %467 = vmatpush1.bf16.msra.mxu0 %v609_v15  ;;  %427 = vmatprep.subr.bf16.mxu1 %v610_v16  ;;  %v651_v43 = vld [vmem:[%s947_s1 + $0x1a0] ss:$8 sps:$4 sm:$0xff]   ;;  %v654_v45 = vld [vmem:[%s947_s1 + $0x1b4] ss:$8 sps:$4 sm:$0xff]   ;;  %v657_v50 = vld [vmem:[%s947_s1 + $0x1b0] ss:$8 sps:$4 sm:$0xff]  }
  0x11   :  { %468 = vmatprep.subr.bf16.mxu0 %v612_v17  ;;  %v16_v46 = vld [vmem:[%s946_s0 + $0x8] sm:$0xff]  ;;  %v18_v48 = vld [vmem:[%s946_s0 + $0x18] sm:$0xff] }
  0x12   :  { %v20_v47 = vpack.c.bf16 %v16_v46, %v16_v46  ;;  %v22_v51 = vpack.c.bf16 %v18_v48, %v18_v48 }
  0x13   :  { %428 = vmatpush1.bf16.msra.mxu1 %v614_v18 }
  0x14   :  { %469 = vmatpush1.bf16.msra.mxu0 %v615_v19  ;;  %429 = vmatprep.subr.bf16.mxu1 %v616_v20 }
  0x15   :  { %470 = vmatprep.subr.bf16.mxu0 %v618_v21 }
  0x17   :  { %430 = vmatpush1.bf16.msra.mxu1 %v620_v22 }
  0x18   :  { %471 = vmatpush1.bf16.msra.mxu0 %v621_v23  ;;  %431 = vmatprep.subr.bf16.mxu1 %v622_v24 }
  0x19   :  { %472 = vmatprep.subr.bf16.mxu0 %v624_v25 }
  0x1b   :  { %432 = vmatpush1.bf16.msra.mxu1 %v626_v26 }
  0x1c   :  { %473 = vmatpush1.bf16.msra.mxu0 %v627_v27  ;;  %433 = vmatprep.subr.bf16.mxu1 %v628_v28 }
  0x1d   :  { %474 = vmatprep.subr.bf16.mxu0 %v630_v29 }
  0x1f   :  { %434 = vmatpush1.bf16.msra.mxu1 %v632_v30 }
  0x20   :  { %475 = vmatpush1.bf16.msra.mxu0 %v633_v31  ;;  %435 = vmatprep.subr.bf16.mxu1 %v634_v32 }
  0x21   :  { %476 = vmatprep.subr.bf16.mxu0 %v636_v33 }
  0x23   :  { %436 = vmatpush1.bf16.msra.mxu1 %v638_v34 }
  0x24   :  { %477 = vmatpush1.bf16.msra.mxu0 %v639_v35  ;;  %437 = vmatprep.subr.bf16.mxu1 %v640_v36 }
  0x25   :  { %478 = vmatprep.subr.bf16.mxu0 %v642_v37 }
  0x27   :  { %438 = vmatpush1.bf16.msra.mxu1 %v644_v38 }
  0x28   :  { %479 = vmatpush1.bf16.msra.mxu0 %v645_v39  ;;  %439 = vmatprep.subr.bf16.mxu1 %v646_v40 }
  0x29   :  { %480 = vmatprep.subr.bf16.mxu0 %v648_v41 }
  0x2b   :  { %440 = vmatpush1.bf16.msra.mxu1 %v650_v42 }
  0x2c   :  { %481 = vmatpush1.bf16.msra.mxu0 %v651_v43 }
  0x2d   :  { %8 = vsyncpa [#allocation3], 0  ;;  %441 = vmatprep.subr.bf16.mxu1 %v652_v44  ;;  %482 = vmatprep.subr.bf16.mxu0 %v654_v45  ;;  %v658_v52 = vld [vmem:[%s947_s1 + $0xc4] ss:$8 sps:$4 sm:$0xff]   ;;  %v662_v54 = vld [vmem:[%s947_s1 + $0xc0] ss:$8 sps:$4 sm:$0xff]   ;;  %v89_v8 = vlaneseq }
  0x2e   :  { %v660_v53 = vld [vmem:[%s947_s1 + $0x1c4] ss:$8 sps:$4 sm:$0xff]   ;;  %451 = vmatprep.mubr.bf16.mxu1 %v20_v47  ;;  %492 = vmatprep.mubr.bf16.mxu0 %v22_v51  ;;  %v663_v55 = vld [vmem:[%s947_s1 + $0x1c0] ss:$8 sps:$4 sm:$0xff]   ;;  %v664_v56 = vld [vmem:[%s947_s1 + $0xd4] ss:$8 sps:$4 sm:$0xff]  }
  0x2f   :  { %442 = vmatpush1.bf16.msra.mxu1 %v656_v49  ;;  %v666_v57 = vld [vmem:[%s947_s1 + $0x1d4] ss:$8 sps:$4 sm:$0xff]   ;;  %v668_v58 = vld [vmem:[%s947_s1 + $0xd0] ss:$8 sps:$4 sm:$0xff]   ;;  %v670_v60 = vld [vmem:[%s947_s1 + $0xe4] ss:$8 sps:$4 sm:$0xff]  }
  0x30   :  { %483 = vmatpush1.bf16.msra.mxu0 %v657_v50  ;;  %443 = vmatprep.subr.bf16.mxu1 %v658_v52  ;;  %v669_v59 = vld [vmem:[%s947_s1 + $0x1d0] ss:$8 sps:$4 sm:$0xff]   ;;  %v672_v61 = vld [vmem:[%s947_s1 + $0x1e4] ss:$8 sps:$4 sm:$0xff]   ;;  %v674_v62 = vld [vmem:[%s947_s1 + $0xe0] ss:$8 sps:$4 sm:$0xff]  }
  0x31   :  { %484 = vmatprep.subr.bf16.mxu0 %v660_v53  ;;  %v675_v63 = vld [vmem:[%s947_s1 + $0x1e0] ss:$8 sps:$4 sm:$0xff]   ;;  %v676_v0 = vld [vmem:[%s947_s1 + $0xf4] ss:$8 sps:$4 sm:$0xff]   ;;  %v680_v2 = vld [vmem:[%s947_s1 + $0xf0] ss:$8 sps:$4 sm:$0xff]  }
  0x32   :  { %v678_v1 = vld [vmem:[%s947_s1 + $0x1f4] ss:$8 sps:$4 sm:$0xff]   ;;  %v681_v3 = vld [vmem:[%s947_s1 + $0x1f0] ss:$8 sps:$4 sm:$0xff]   ;;  %v15_v4 = vld [vmem:[%s946_s0] sm:$0xff]  ;;  %v90_v9 = vshrl.u32 %v89_v8, 7 }
  0x33   :  { %444 = vmatpush1.bf16.msra.mxu1 %v662_v54  ;;  %v17_v5 = vld [vmem:[%s946_s0 + $0x10] sm:$0xff]  ;;  %v19_v6 = vpack.c.bf16 %v15_v4, %v15_v4  ;;  %v87_v11 = vld [vmem:[%s948_s2] sm:$0x3]  ;;  %s706_s0 = smov [#allocation2]  }
  0x34   :  { %485 = vmatpush1.bf16.msra.mxu0 %v663_v55  ;;  %445 = vmatprep.subr.bf16.mxu1 %v664_v56  ;;  %v21_v7 = vpack.c.bf16 %v17_v5, %v17_v5  ;;  %v91_v10 = vsub.s32 0, %v90_v9  ;;  %v95_v12 = vsub.s32 1, %v90_v9  ;;  %s509_s14 = sshll.u32 %s706_s0, 4  ;;  %s510_s14 = int_to_ptr.vmem [resolvable:$true] %s509_s14 }
  0x35   :  { %486 = vmatprep.subr.bf16.mxu0 %v666_v57  ;;  %s682_s2 = scalar_lea.vmem %s510_s14, 256  ;;  %p687_p1 = scmp.lt.s32.totalorder %s510_s14, %s510_s14 }
  0x36   :  { %v92_v13 = vrot.slane %v87_v11, %v91_v10  ;;  %v96_v14 = vrot.slane %v87_v11, %v95_v12  ;;  %p683_p0 = scmp.ne.s32.totalorder %s510_s14, %s682_s2  ;;  %p688_p2 = scmp.lt.s32.totalorder %s682_s2, %s682_s2 }
  0x37   :  { %446 = vmatpush1.bf16.msra.mxu1 %v668_v58 }
  0x38   :  { %487 = vmatpush1.bf16.msra.mxu0 %v669_v59  ;;  %447 = vmatprep.subr.bf16.mxu1 %v670_v60  ;;  %p689_p3 = por %p688_p2, %p687_p1 }
  0x39   :  { %488 = vmatprep.subr.bf16.mxu0 %v672_v61 }
  0x3a   :  { %p690_p4 = pnand %p689_p3, %p683_p0 }
  0x3b   :  { %448 = vmatpush1.bf16.msra.mxu1 %v674_v62 }
  0x3c   :  { %489 = vmatpush1.bf16.msra.mxu0 %v675_v63  ;;  %449 = vmatprep.subr.bf16.mxu1 %v676_v0 }
  0x3d   :  { %490 = vmatprep.subr.bf16.mxu0 %v678_v1 }
  0x3f   :  { %450 = vmatpush1.bf16.msra.mxu1 %v680_v2 }
  0x40   :  { %491 = vmatpush1.bf16.msra.mxu0 %v681_v3 }
  0x42   :  { %452 = vmatmul.mubr.bf16.vlgmr.msra.gmra.mrb[0].mxu1 %v19_v6 }
  0x43   :  { %493 = vmatmul.mubr.bf16.vlgmr.msra.gmra.mrb[0].mxu0 %v21_v7 }
 0x115   :  { %v453_v15 = vpop.f32.mrb[0].mxu1 }
 0x116   :  { %v494_v16 = vpop.f32.mrb[0].mxu0  ;;  %v454_v17 = vadd.f32 %v453_v15, %v92_v13  ;;  %v455_v18 = vpop.f32.mrb[1].mxu1 }
 0x117   :  { %v496_v19 = vpop.f32.mrb[1].mxu0  ;;  %v456_v20 = vadd.f32 %v455_v18, %v96_v14  ;;  %v457_v21 = vpop.f32.mrb[2].mxu1 }
 0x118   :  { %v498_v22 = vpop.f32.mrb[2].mxu0  ;;  %v495_v23 = vadd.f32 %v494_v16, %v454_v17  ;;  %v458_v24 = vpop.f32.mrb[3].mxu1 }
 0x119   :  { %v499_v25 = vpop.f32.mrb[3].mxu0  ;;  %v497_v26 = vadd.f32 %v496_v19, %v456_v20 }
 0x11a   :  { %501 = vst [vmem:[#allocation2] sm:$0xff] %v495_v23 }
 0x11b   :  { %502 = vst [vmem:[#allocation2 + $0x8] sm:$0xff] %v497_v26 }
 0x11c   :  { %693 = shalt.err (!%p690_p4)
}
 0x11d   :  { %s694_s17 = scalar_lea.hbm %s949_s3, 256 }
 0x11e   :  { %p695_p5 = scmp.ne.s32.totalorder %s949_s3, %s694_s17  ;;  %p698_p6 = scmp.lt.u32.totalorder %s694_s17, %s949_s3 }
 0x120   :  { %p700_p7 = pnand %p698_p6, %p695_p5 }
 0x122   :  { %703 = shalt.err (!%p700_p7)
}
 0x123   :  { %512 = dma.vmem_to_hbm [thread:$0]  %s510_s14, 256, %s949_s3, [#allocation3]  }
 0x124   :  { %704 = dma.done.wait [#allocation3], 256  }
 0x125   :  { %705 = vsyncadd [#allocation3], 4294967040 }
 0x126   :  { %516 = vsyncpa [#allocation3], 1 }

// kernel: vae_forward.12
= control target key start
LH: loop header
LB: loop body
LE: loop exit
PB: predicated region body
PF: predicated region fallthrough
CT: control target
= control target key end

     0   :  { %s1381_s1 = inlined_call_operand.vmem [shape: bf16[384,512], index: 1, kind: input, shape index: {}]   ;;  %s1382_s0 = inlined_call_operand.vmem [shape: f32[8,384], index: 0, kind: input, shape index: {}]   ;;  %s1383_s2 = inlined_call_operand.vmem [shape: f32[1,512], index: 2, kind: input, shape index: {}]   ;;  %s1384_s3 = inlined_call_operand.vmem [shape: f32[8,512], index: 3, kind: output, shape index: {}]  }
   0x1   :  { %v904_v0 = vld [vmem:[%s1381_s1 + $0x4] ss:$16 sps:$4 sm:$0xff]   ;;  %v906_v1 = vld [vmem:[%s1381_s1 + $0xc] ss:$16 sps:$4 sm:$0xff]   ;;  %v908_v2 = vld [vmem:[%s1381_s1] ss:$16 sps:$4 sm:$0xff]  }
   0x2   :  { %619 = vmatprep.subr.bf16.mxu0 %v904_v0  ;;  %v909_v3 = vld [vmem:[%s1381_s1 + $0x8] ss:$16 sps:$4 sm:$0xff]   ;;  %701 = vmatprep.subr.bf16.mxu1 %v906_v1  ;;  %v910_v4 = vld [vmem:[%s1381_s1 + $0x24] ss:$16 sps:$4 sm:$0xff]   ;;  %v912_v5 = vld [vmem:[%s1381_s1 + $0x2c] ss:$16 sps:$4 sm:$0xff]  }
   0x3   :  { %620 = vmatpush1.bf16.msra.mxu0 %v908_v2  ;;  %702 = vmatpush1.bf16.msra.mxu1 %v909_v3  ;;  %v914_v6 = vld [vmem:[%s1381_s1 + $0x20] ss:$16 sps:$4 sm:$0xff]   ;;  %v915_v7 = vld [vmem:[%s1381_s1 + $0x28] ss:$16 sps:$4 sm:$0xff]   ;;  %v916_v8 = vld [vmem:[%s1381_s1 + $0x44] ss:$16 sps:$4 sm:$0xff]  }
   0x4   :  { %621 = vmatprep.subr.bf16.mxu0 %v910_v4  ;;  %703 = vmatprep.subr.bf16.mxu1 %v912_v5  ;;  %v918_v9 = vld [vmem:[%s1381_s1 + $0x4c] ss:$16 sps:$4 sm:$0xff]   ;;  %v920_v10 = vld [vmem:[%s1381_s1 + $0x40] ss:$16 sps:$4 sm:$0xff]   ;;  %v921_v11 = vld [vmem:[%s1381_s1 + $0x48] ss:$16 sps:$4 sm:$0xff]  }
   0x5   :  { %v922_v12 = vld [vmem:[%s1381_s1 + $0x64] ss:$16 sps:$4 sm:$0xff]   ;;  %v924_v13 = vld [vmem:[%s1381_s1 + $0x6c] ss:$16 sps:$4 sm:$0xff]   ;;  %v926_v14 = vld [vmem:[%s1381_s1 + $0x60] ss:$16 sps:$4 sm:$0xff]  }
   0x6   :  { %v927_v15 = vld [vmem:[%s1381_s1 + $0x68] ss:$16 sps:$4 sm:$0xff]   ;;  %v928_v16 = vld [vmem:[%s1381_s1 + $0x84] ss:$16 sps:$4 sm:$0xff]   ;;  %v930_v17 = vld [vmem:[%s1381_s1 + $0x8c] ss:$16 sps:$4 sm:$0xff]  }
   0x7   :  { %622 = vmatpush1.bf16.msra.mxu0 %v914_v6  ;;  %704 = vmatpush1.bf16.msra.mxu1 %v915_v7  ;;  %v932_v18 = vld [vmem:[%s1381_s1 + $0x80] ss:$16 sps:$4 sm:$0xff]   ;;  %v933_v19 = vld [vmem:[%s1381_s1 + $0x88] ss:$16 sps:$4 sm:$0xff]   ;;  %v934_v20 = vld [vmem:[%s1381_s1 + $0xa4] ss:$16 sps:$4 sm:$0xff]  }
   0x8   :  { %623 = vmatprep.subr.bf16.mxu0 %v916_v8  ;;  %705 = vmatprep.subr.bf16.mxu1 %v918_v9  ;;  %v936_v21 = vld [vmem:[%s1381_s1 + $0xac] ss:$16 sps:$4 sm:$0xff]   ;;  %v938_v22 = vld [vmem:[%s1381_s1 + $0xa0] ss:$16 sps:$4 sm:$0xff]   ;;  %v939_v23 = vld [vmem:[%s1381_s1 + $0xa8] ss:$16 sps:$4 sm:$0xff]  }
   0x9   :  { %v940_v24 = vld [vmem:[%s1381_s1 + $0xc4] ss:$16 sps:$4 sm:$0xff]   ;;  %v942_v25 = vld [vmem:[%s1381_s1 + $0xcc] ss:$16 sps:$4 sm:$0xff]   ;;  %v944_v26 = vld [vmem:[%s1381_s1 + $0xc0] ss:$16 sps:$4 sm:$0xff]  }
   0xa   :  { %v945_v27 = vld [vmem:[%s1381_s1 + $0xc8] ss:$16 sps:$4 sm:$0xff]   ;;  %v946_v28 = vld [vmem:[%s1381_s1 + $0xe4] ss:$16 sps:$4 sm:$0xff]   ;;  %v948_v29 = vld [vmem:[%s1381_s1 + $0xec] ss:$16 sps:$4 sm:$0xff]  }
   0xb   :  { %624 = vmatpush1.bf16.msra.mxu0 %v920_v10  ;;  %706 = vmatpush1.bf16.msra.mxu1 %v921_v11  ;;  %v950_v30 = vld [vmem:[%s1381_s1 + $0xe0] ss:$16 sps:$4 sm:$0xff]   ;;  %v951_v31 = vld [vmem:[%s1381_s1 + $0xe8] ss:$16 sps:$4 sm:$0xff]   ;;  %v952_v32 = vld [vmem:[%s1381_s1 + $0x104] ss:$16 sps:$4 sm:$0xff]  }
   0xc   :  { %625 = vmatprep.subr.bf16.mxu0 %v922_v12  ;;  %707 = vmatprep.subr.bf16.mxu1 %v924_v13  ;;  %v954_v33 = vld [vmem:[%s1381_s1 + $0x10c] ss:$16 sps:$4 sm:$0xff]   ;;  %v956_v34 = vld [vmem:[%s1381_s1 + $0x100] ss:$16 sps:$4 sm:$0xff]   ;;  %v957_v35 = vld [vmem:[%s1381_s1 + $0x108] ss:$16 sps:$4 sm:$0xff]  }
   0xd   :  { %v958_v36 = vld [vmem:[%s1381_s1 + $0x124] ss:$16 sps:$4 sm:$0xff]   ;;  %v960_v37 = vld [vmem:[%s1381_s1 + $0x12c] ss:$16 sps:$4 sm:$0xff]   ;;  %v962_v38 = vld [vmem:[%s1381_s1 + $0x120] ss:$16 sps:$4 sm:$0xff]  }
   0xe   :  { %v963_v39 = vld [vmem:[%s1381_s1 + $0x128] ss:$16 sps:$4 sm:$0xff]   ;;  %v964_v40 = vld [vmem:[%s1381_s1 + $0x144] ss:$16 sps:$4 sm:$0xff]   ;;  %v966_v41 = vld [vmem:[%s1381_s1 + $0x14c] ss:$16 sps:$4 sm:$0xff]  }
   0xf   :  { %626 = vmatpush1.bf16.msra.mxu0 %v926_v14  ;;  %708 = vmatpush1.bf16.msra.mxu1 %v927_v15  ;;  %v968_v42 = vld [vmem:[%s1381_s1 + $0x140] ss:$16 sps:$4 sm:$0xff]   ;;  %v969_v43 = vld [vmem:[%s1381_s1 + $0x148] ss:$16 sps:$4 sm:$0xff]   ;;  %v970_v44 = vld [vmem:[%s1381_s1 + $0x164] ss:$16 sps:$4 sm:$0xff]  }
  0x10   :  { %627 = vmatprep.subr.bf16.mxu0 %v928_v16  ;;  %709 = vmatprep.subr.bf16.mxu1 %v930_v17  ;;  %v972_v45 = vld [vmem:[%s1381_s1 + $0x16c] ss:$16 sps:$4 sm:$0xff]   ;;  %v974_v48 = vld [vmem:[%s1381_s1 + $0x160] ss:$16 sps:$4 sm:$0xff]   ;;  %v975_v49 = vld [vmem:[%s1381_s1 + $0x168] ss:$16 sps:$4 sm:$0xff]  }
  0x11   :  { %v16_v46 = vld [vmem:[%s1382_s0 + $0x8] sm:$0xff]  ;;  %v976_v50 = vld [vmem:[%s1381_s1 + $0x184] ss:$16 sps:$4 sm:$0xff]   ;;  %v980_v52 = vld [vmem:[%s1381_s1 + $0x180] ss:$16 sps:$4 sm:$0xff]   ;;  %v1048_v14 = vmov 0  }
  0x12   :  { %v19_v47 = vpack.c.bf16 %v16_v46, %v16_v46  ;;  %v978_v51 = vld [vmem:[%s1381_s1 + $0x18c] ss:$16 sps:$4 sm:$0xff]   ;;  %v981_v53 = vld [vmem:[%s1381_s1 + $0x188] ss:$16 sps:$4 sm:$0xff]   ;;  %v982_v54 = vld [vmem:[%s1381_s1 + $0x1a4] ss:$16 sps:$4 sm:$0xff]  }
  0x13   :  { %628 = vmatpush1.bf16.msra.mxu0 %v932_v18  ;;  %710 = vmatpush1.bf16.msra.mxu1 %v933_v19  ;;  %v984_v55 = vld [vmem:[%s1381_s1 + $0x1ac] ss:$16 sps:$4 sm:$0xff]   ;;  %v986_v56 = vld [vmem:[%s1381_s1 + $0x1a0] ss:$16 sps:$4 sm:$0xff]   ;;  %v987_v57 = vld [vmem:[%s1381_s1 + $0x1a8] ss:$16 sps:$4 sm:$0xff]  }
  0x14   :  { %629 = vmatprep.subr.bf16.mxu0 %v934_v20  ;;  %711 = vmatprep.subr.bf16.mxu1 %v936_v21  ;;  %v988_v58 = vld [vmem:[%s1381_s1 + $0x1c4] ss:$16 sps:$4 sm:$0xff]   ;;  %v990_v59 = vld [vmem:[%s1381_s1 + $0x1cc] ss:$16 sps:$4 sm:$0xff]   ;;  %v992_v60 = vld [vmem:[%s1381_s1 + $0x1c0] ss:$16 sps:$4 sm:$0xff]  }
  0x15   :  { %651 = vmatprep.mubr.bf16.mxu0 %v19_v47  ;;  %733 = vmatprep.mubr.bf16.mxu1 %v19_v47  ;;  %v993_v61 = vld [vmem:[%s1381_s1 + $0x1c8] ss:$16 sps:$4 sm:$0xff]   ;;  %v994_v62 = vld [vmem:[%s1381_s1 + $0x1e4] ss:$16 sps:$4 sm:$0xff]   ;;  %v996_v63 = vld [vmem:[%s1381_s1 + $0x1ec] ss:$16 sps:$4 sm:$0xff]  }
  0x16   :  { %v998_v0 = vld [vmem:[%s1381_s1 + $0x1e0] ss:$16 sps:$4 sm:$0xff]   ;;  %v999_v1 = vld [vmem:[%s1381_s1 + $0x1e8] ss:$16 sps:$4 sm:$0xff]   ;;  %v1002_v2 = vld [vmem:[%s1381_s1 + $0x204] ss:$16 sps:$4 sm:$0xff]  }
  0x17   :  { %630 = vmatpush1.bf16.msra.mxu0 %v938_v22  ;;  %712 = vmatpush1.bf16.msra.mxu1 %v939_v23  ;;  %v15_v3 = vld [vmem:[%s1382_s0] sm:$0xff]  ;;  %v1005_v4 = vld [vmem:[%s1381_s1 + $0x20c] ss:$16 sps:$4 sm:$0xff]   ;;  %v1003_v7 = vld [vmem:[%s1381_s1 + $0x208] ss:$16 sps:$4 sm:$0xff]  }
  0x18   :  { %631 = vmatprep.subr.bf16.mxu0 %v940_v24  ;;  %713 = vmatprep.subr.bf16.mxu1 %v942_v25  ;;  %v18_v5 = vpack.c.bf16 %v15_v3, %v15_v3  ;;  %v1000_v6 = vld [vmem:[%s1381_s1 + $0x200] ss:$16 sps:$4 sm:$0xff]   ;;  %v1008_v8 = vld [vmem:[%s1381_s1 + $0x224] ss:$16 sps:$4 sm:$0xff]   ;;  %v1011_v9 = vld [vmem:[%s1381_s1 + $0x22c] ss:$16 sps:$4 sm:$0xff]  }
  0x19   :  { %v1006_v10 = vld [vmem:[%s1381_s1 + $0x220] ss:$16 sps:$4 sm:$0xff]   ;;  %v1009_v11 = vld [vmem:[%s1381_s1 + $0x228] ss:$16 sps:$4 sm:$0xff]   ;;  %v1014_v12 = vld [vmem:[%s1381_s1 + $0x244] ss:$16 sps:$4 sm:$0xff]  }
  0x1a   :  { %v1017_v13 = vld [vmem:[%s1381_s1 + $0x24c] ss:$16 sps:$4 sm:$0xff]   ;;  %v1012_v15 = vld [vmem:[%s1381_s1 + $0x240] ss:$16 sps:$4 sm:$0xff]   ;;  %v1015_v16 = vld [vmem:[%s1381_s1 + $0x248] ss:$16 sps:$4 sm:$0xff]  }
  0x1b   :  { %632 = vmatpush1.bf16.msra.mxu0 %v944_v26  ;;  %714 = vmatpush1.bf16.msra.mxu1 %v945_v27  ;;  %v1020_v17 = vld [vmem:[%s1381_s1 + $0x264] ss:$16 sps:$4 sm:$0xff]   ;;  %v1023_v18 = vld [vmem:[%s1381_s1 + $0x26c] ss:$16 sps:$4 sm:$0xff]   ;;  %v1018_v19 = vld [vmem:[%s1381_s1 + $0x260] ss:$16 sps:$4 sm:$0xff]  }
  0x1c   :  { %633 = vmatprep.subr.bf16.mxu0 %v946_v28  ;;  %715 = vmatprep.subr.bf16.mxu1 %v948_v29  ;;  %v1021_v20 = vld [vmem:[%s1381_s1 + $0x268] ss:$16 sps:$4 sm:$0xff]   ;;  %v1026_v21 = vld [vmem:[%s1381_s1 + $0x284] ss:$16 sps:$4 sm:$0xff]   ;;  %v1029_v22 = vld [vmem:[%s1381_s1 + $0x28c] ss:$16 sps:$4 sm:$0xff]  }
  0x1d   :  { %v1024_v23 = vld [vmem:[%s1381_s1 + $0x280] ss:$16 sps:$4 sm:$0xff]   ;;  %v1027_v24 = vld [vmem:[%s1381_s1 + $0x288] ss:$16 sps:$4 sm:$0xff]   ;;  %v1032_v25 = vld [vmem:[%s1381_s1 + $0x2a4] ss:$16 sps:$4 sm:$0xff]  }
  0x1e   :  { %v1035_v26 = vld [vmem:[%s1381_s1 + $0x2ac] ss:$16 sps:$4 sm:$0xff]   ;;  %v1030_v27 = vld [vmem:[%s1381_s1 + $0x2a0] ss:$16 sps:$4 sm:$0xff]   ;;  %v1033_v28 = vld [vmem:[%s1381_s1 + $0x2a8] ss:$16 sps:$4 sm:$0xff]  }
  0x1f   :  { %634 = vmatpush1.bf16.msra.mxu0 %v950_v30  ;;  %716 = vmatpush1.bf16.msra.mxu1 %v951_v31  ;;  %v1038_v29 = vld [vmem:[%s1381_s1 + $0x2c4] ss:$16 sps:$4 sm:$0xff]   ;;  %v1041_v30 = vld [vmem:[%s1381_s1 + $0x2cc] ss:$16 sps:$4 sm:$0xff]   ;;  %v1036_v31 = vld [vmem:[%s1381_s1 + $0x2c0] ss:$16 sps:$4 sm:$0xff]  }
  0x20   :  { %635 = vmatprep.subr.bf16.mxu0 %v952_v32  ;;  %717 = vmatprep.subr.bf16.mxu1 %v954_v33  ;;  %v1039_v32 = vld [vmem:[%s1381_s1 + $0x2c8] ss:$16 sps:$4 sm:$0xff]   ;;  %v1044_v33 = vld [vmem:[%s1381_s1 + $0x2e4] ss:$16 sps:$4 sm:$0xff]  }
  0x23   :  { %636 = vmatpush1.bf16.msra.mxu0 %v956_v34  ;;  %718 = vmatpush1.bf16.msra.mxu1 %v957_v35  ;;  %v1047_v34 = vld [vmem:[%s1381_s1 + $0x2ec] ss:$16 sps:$4 sm:$0xff]   ;;  %v17_v35 = vld [vmem:[%s1382_s0 + $0x10] sm:$0xff] }
  0x24   :  { %637 = vmatprep.subr.bf16.mxu0 %v958_v36  ;;  %719 = vmatprep.subr.bf16.mxu1 %v960_v37  ;;  %v1042_v36 = vld [vmem:[%s1381_s1 + $0x2e0] ss:$16 sps:$4 sm:$0xff]   ;;  %v1045_v37 = vld [vmem:[%s1381_s1 + $0x2e8] ss:$16 sps:$4 sm:$0xff]  }
  0x27   :  { %638 = vmatpush1.bf16.msra.mxu0 %v962_v38  ;;  %720 = vmatpush1.bf16.msra.mxu1 %v963_v39  ;;  %v20_v38 = vpack.c.bf16 %v17_v35, %v17_v35  ;;  %v119_v39 = vlaneseq }
  0x28   :  { %639 = vmatprep.subr.bf16.mxu0 %v964_v40  ;;  %721 = vmatprep.subr.bf16.mxu1 %v966_v41 }
  0x29   :  { %v120_v40 = vshrl.u32 %v119_v39, 7 }
  0x2b   :  { %640 = vmatpush1.bf16.msra.mxu0 %v968_v42  ;;  %722 = vmatpush1.bf16.msra.mxu1 %v969_v43  ;;  %v121_v41 = vsub.s32 0, %v120_v40  ;;  %v129_v42 = vsub.s32 2, %v120_v40  ;;  %v117_v43 = vld [vmem:[%s1383_s2] sm:$0xf] }
  0x2c   :  { %641 = vmatprep.subr.bf16.mxu0 %v970_v44  ;;  %723 = vmatprep.subr.bf16.mxu1 %v972_v45  ;;  %v125_v44 = vsub.s32 1, %v120_v40  ;;  %v133_v45 = vsub.s32 3, %v120_v40 }
  0x2d   :  { %v122_v46 = vrot.slane %v117_v43, %v121_v41  ;;  %v130_v47 = vrot.slane %v117_v43, %v129_v42 }
  0x2f   :  { %642 = vmatpush1.bf16.msra.mxu0 %v974_v48  ;;  %724 = vmatpush1.bf16.msra.mxu1 %v975_v49  ;;  %v126_v48 = vrot.slane %v117_v43, %v125_v44  ;;  %v134_v49 = vrot.slane %v117_v43, %v133_v45 }
  0x30   :  { %643 = vmatprep.subr.bf16.mxu0 %v976_v50  ;;  %725 = vmatprep.subr.bf16.mxu1 %v978_v51 }
  0x33   :  { %644 = vmatpush1.bf16.msra.mxu0 %v980_v52  ;;  %726 = vmatpush1.bf16.msra.mxu1 %v981_v53 }
  0x34   :  { %645 = vmatprep.subr.bf16.mxu0 %v982_v54  ;;  %727 = vmatprep.subr.bf16.mxu1 %v984_v55 }
  0x37   :  { %646 = vmatpush1.bf16.msra.mxu0 %v986_v56  ;;  %728 = vmatpush1.bf16.msra.mxu1 %v987_v57 }
  0x38   :  { %647 = vmatprep.subr.bf16.mxu0 %v988_v58  ;;  %729 = vmatprep.subr.bf16.mxu1 %v990_v59 }
  0x3b   :  { %648 = vmatpush1.bf16.msra.mxu0 %v992_v60  ;;  %730 = vmatpush1.bf16.msra.mxu1 %v993_v61 }
  0x3c   :  { %649 = vmatprep.subr.bf16.mxu0 %v994_v62  ;;  %731 = vmatprep.subr.bf16.mxu1 %v996_v63 }
  0x3f   :  { %650 = vmatpush1.bf16.msra.mxu0 %v998_v0  ;;  %732 = vmatpush1.bf16.msra.mxu1 %v999_v1 }
  0x40   :  { %660 = vmatprep.subr.bf16.mxu0 %v1002_v2  ;;  %742 = vmatprep.subr.bf16.mxu1 %v1005_v4 }
  0x42   :  { %652 = vmatmul.mubr.bf16.vlgmr.msra.gmra.mrb[0].mxu0 %v18_v5  ;;  %734 = vmatmul.mubr.bf16.vlgmr.msra.gmra.mrb[0].mxu1 %v18_v5 }
  0x43   :  { %661 = vmatpush1.bf16.msra.mxu0 %v1000_v6  ;;  %743 = vmatpush1.bf16.msra.mxu1 %v1003_v7 }
  0x44   :  { %662 = vmatprep.subr.bf16.mxu0 %v1008_v8  ;;  %744 = vmatprep.subr.bf16.mxu1 %v1011_v9 }
  0x45   :  { %692 = vmatprep.mubr.bf16.mxu0 %v1048_v14  ;;  %774 = vmatprep.mubr.bf16.mxu1 %v1048_v14 }
  0x47   :  { %663 = vmatpush1.bf16.msra.mxu0 %v1006_v10  ;;  %745 = vmatpush1.bf16.msra.mxu1 %v1009_v11 }
  0x48   :  { %664 = vmatprep.subr.bf16.mxu0 %v1014_v12  ;;  %746 = vmatprep.subr.bf16.mxu1 %v1017_v13 }
  0x4b   :  { %665 = vmatpush1.bf16.msra.mxu0 %v1012_v15  ;;  %747 = vmatpush1.bf16.msra.mxu1 %v1015_v16 }
  0x4c   :  { %666 = vmatprep.subr.bf16.mxu0 %v1020_v17  ;;  %748 = vmatprep.subr.bf16.mxu1 %v1023_v18 }
  0x4f   :  { %667 = vmatpush1.bf16.msra.mxu0 %v1018_v19  ;;  %749 = vmatpush1.bf16.msra.mxu1 %v1021_v20 }
  0x50   :  { %668 = vmatprep.subr.bf16.mxu0 %v1026_v21  ;;  %750 = vmatprep.subr.bf16.mxu1 %v1029_v22 }
  0x53   :  { %669 = vmatpush1.bf16.msra.mxu0 %v1024_v23  ;;  %751 = vmatpush1.bf16.msra.mxu1 %v1027_v24 }
  0x54   :  { %670 = vmatprep.subr.bf16.mxu0 %v1032_v25  ;;  %752 = vmatprep.subr.bf16.mxu1 %v1035_v26 }
  0x57   :  { %671 = vmatpush1.bf16.msra.mxu0 %v1030_v27  ;;  %753 = vmatpush1.bf16.msra.mxu1 %v1033_v28 }
  0x58   :  { %672 = vmatprep.subr.bf16.mxu0 %v1038_v29  ;;  %754 = vmatprep.subr.bf16.mxu1 %v1041_v30 }
  0x5b   :  { %673 = vmatpush1.bf16.msra.mxu0 %v1036_v31  ;;  %755 = vmatpush1.bf16.msra.mxu1 %v1039_v32 }
  0x5c   :  { %674 = vmatprep.subr.bf16.mxu0 %v1044_v33  ;;  %756 = vmatprep.subr.bf16.mxu1 %v1047_v34 }
  0x5f   :  { %675 = vmatpush1.bf16.msra.mxu0 %v1042_v36  ;;  %757 = vmatpush1.bf16.msra.mxu1 %v1045_v37 }
  0x62   :  { %693 = vmatmul.mubr.bf16.vlgmr.msra.gmra.mrb[0].mxu0 %v20_v38  ;;  %775 = vmatmul.mubr.bf16.vlgmr.msra.gmra.mrb[0].mxu1 %v20_v38 }
 0x135   :  { %v694_v50 = vpop.f32.mrb[0].mxu0  ;;  %v776_v51 = vpop.f32.mrb[0].mxu1 }
 0x136   :  { %v891_v52 = vadd.f32 %v694_v50, %v122_v46  ;;  %v893_v53 = vadd.f32 %v776_v51, %v130_v47  ;;  %v696_v54 = vpop.f32.mrb[1].mxu0  ;;  %v778_v55 = vpop.f32.mrb[1].mxu1 }
 0x137   :  { %v892_v56 = vadd.f32 %v696_v54, %v126_v48  ;;  %v894_v57 = vadd.f32 %v778_v55, %v134_v49  ;;  %v698_v58 = vpop.f32.mrb[2].mxu0  ;;  %v780_v59 = vpop.f32.mrb[2].mxu1 }
 0x138   :  { %v783_v60 = vmax.f32 %v891_v52, 0.0  ;;  %v785_v61 = vmax.f32 %v893_v53, 0.0  ;;  %v699_v62 = vpop.f32.mrb[3].mxu0  ;;  %v781_v63 = vpop.f32.mrb[3].mxu1 }
 0x139   :  { %v784_v0 = vmax.f32 %v892_v56, 0.0  ;;  %v786_v1 = vmax.f32 %v894_v57, 0.0 }
 0x13a   :  { %787 = vst [vmem:[%s1384_s3] sm:$0xff] %v783_v60  ;;  %789 = vst [vmem:[%s1384_s3 + $0x10] sm:$0xff] %v785_v61 }
 0x13b   :  { %788 = vst [vmem:[%s1384_s3 + $0x8] sm:$0xff] %v784_v0  ;;  %790 = vst [vmem:[%s1384_s3 + $0x18] sm:$0xff] %v786_v1 }

</bundles_post_ra>
